<compile_context>
chip_gen: v6e
topology: v6e:2x2x1
jax: 0.10.0
libtpu: 0.0.40
codegen_flags: <defaults>
</compile_context>

<pallas_src>
import jax
import jax.numpy as jnp
from jax import lax
from jax.experimental import pallas as pl
from jax.experimental.pallas import tpu as pltpu


# ---------------------------------------------------------------------------
# Pallas kernel: one invocation processes the whole batch.
# ---------------------------------------------------------------------------
def _pmtn_kernel(xp_ref, wve_ref, bve_ref, wenc_ref, benc_ref,
                 wih_ref, whh_ref, blstm_ref, wfc_ref, bfc_ref, h0_ref,
                 out_ref):
    B, P = out_ref.shape
    d = h0_ref.shape[1]

    # --- patch embedding (Conv2d kernel (1, nvars) collapsed to matmul) + encoder Linear.
    # Rows are time-major: row t*B + b  <->  (patch t, batch b).
    xp = xp_ref[...]                                                          # (P*B, patch_len*nvars)
    u = jnp.dot(xp, wve_ref[...], preferred_element_type=jnp.float32) + bve_ref[...]
    f = jnp.dot(u, wenc_ref[...], preferred_element_type=jnp.float32) + benc_ref[...]   # (P*B, d)

    # --- hoisted input->hidden LSTM projection for ALL timesteps, all 4 gates fused
    # (single matmul, 4d output lanes).  Gate order along the last axis is PyTorch's
    # native [i | f | g | o] packing, so no reshuffle is needed.
    gx = jnp.dot(f, wih_ref[...], preferred_element_type=jnp.float32) + blstm_ref[...]  # (P*B, 4d)

    # loop-invariant params, loaded once
    whh = whh_ref[...]          # (d, 4d)
    wfc = wfc_ref[...]          # (1, d)
    bfc = bfc_ref[...]          # (1, 1)

    h = h0_ref[...]             # (B, d) -- whole batch at once
    c = jnp.zeros_like(h)

    # --- LSTM recurrence, fully unrolled (P is compile-time known and small).
    cols = []
    for t in range(P):
        # one fused matmul per step: (B, d) @ (d, 4d)
        g = gx[t * B:(t + 1) * B, :] + jnp.dot(h, whh, preferred_element_type=jnp.float32)
        gi = g[:, 0:d]
        gf = g[:, d:2 * d]
        gg = g[:, 2 * d:3 * d]
        go = g[:, 3 * d:4 * d]
        c = jax.nn.sigmoid(gf) * c + jax.nn.sigmoid(gi) * jnp.tanh(gg)
        h = jax.nn.sigmoid(go) * jnp.tanh(c)
        # fc fused into the step as a lane-wise multiply + reduce (no (d,1) matmul,
        # no trailing-1 output array); logit kept in registers.
        cols.append(jnp.sum(h * wfc, axis=-1, keepdims=True) + bfc)           # (B, 1)

    # single lane-dense store of the whole (B, P) output
    out_ref[...] = jax.nn.sigmoid(jnp.concatenate(cols, axis=-1))


# ---------------------------------------------------------------------------
# Wrapper: host-side layout prep + pallas_call (single invocation, whole batch).
# ---------------------------------------------------------------------------
def pmtn_forward(x, params, SOCocv=None, socoCV=False):
    B, L, nvars = x.shape
    d = params["enc_w"].shape[0]
    patch_len = params["conv_w"].shape[1]
    assert L % patch_len == 0, "stride == patch_len, so context_length must be divisible"
    P = L // patch_len
    flat = patch_len * nvars

    # xp[b, p, j*nvars + v] = x[b, p*patch_len + j, v]  (== unfold + permute of the PyTorch code),
    # then flattened TIME-MAJOR: row t*B + b.
    xp = x.reshape(B, P, flat)
    xp_tm = jnp.transpose(xp, (1, 0, 2)).reshape(P * B, flat)

    # Pre-transpose weights so every in-kernel matmul is (rows, feat_in) @ (feat_in, feat_out).
    w_ve = jnp.transpose(params["conv_w"].reshape(d, flat))                  # (flat, d)
    b_ve = params["conv_b"].reshape(1, d)
    w_enc = params["enc_w"].T                                                # (d, d)
    b_enc = params["enc_b"].reshape(1, d)

    # LSTM weights kept gate-packed [i|f|g|o] along the output axis (PyTorch layout).
    w_ih = params["w_ih"].T                                                  # (d, 4d)
    w_hh = params["w_hh"].T                                                  # (d, 4d)
    b_lstm = (params["b_ih"] + params["b_hh"]).reshape(1, 4 * d)             # (1, 4d)

    w_fc = params["fc_w"].reshape(1, d)                                      # fc as a lane row
    b_fc = params["fc_b"].reshape(1, 1)

    if socoCV:
        # lstm_embedding Linear(1, d_model): SOCocv (B, 1) -> h0 (B, d_model)
        h0 = SOCocv @ params["le_w"].T + params["le_b"]
    else:
        h0 = jnp.zeros((B, d), jnp.float32)

    out = pl.pallas_call(
        _pmtn_kernel,
        out_shape=jax.ShapeDtypeStruct((B, P), jnp.float32),
        grid=(1,),
        in_specs=[
            pl.BlockSpec((P * B, flat), lambda i: (0, 0)),       # xp (time-major rows)
            pl.BlockSpec((flat, d), lambda i: (0, 0)),           # w_ve
            pl.BlockSpec((1, d), lambda i: (0, 0)),              # b_ve
            pl.BlockSpec((d, d), lambda i: (0, 0)),              # w_enc
            pl.BlockSpec((1, d), lambda i: (0, 0)),              # b_enc
            pl.BlockSpec((d, 4 * d), lambda i: (0, 0)),          # w_ih (gates fused)
            pl.BlockSpec((d, 4 * d), lambda i: (0, 0)),          # w_hh (gates fused)
            pl.BlockSpec((1, 4 * d), lambda i: (0, 0)),          # b_ih + b_hh (gates fused)
            pl.BlockSpec((1, d), lambda i: (0, 0)),              # fc weight (row)
            pl.BlockSpec((1, 1), lambda i: (0, 0)),              # fc bias
            pl.BlockSpec((B, d), lambda i: (0, 0)),              # h0
        ],
        out_specs=pl.BlockSpec((B, P), lambda i: (0, 0)),
        compiler_params=pltpu.CompilerParams(dimension_semantics=("arbitrary",)),
    )(xp_tm, w_ve, b_ve, w_enc, b_enc, w_ih, w_hh, b_lstm, w_fc, b_fc, h0)

    # PyTorch: fc(z).squeeze() -> (B, patch_num)
    return out


# ---------------------------------------------------------------------------
# Pure-JAX reference (same math) for a correctness check.
# ---------------------------------------------------------------------------
def pmtn_reference(x, params, SOCocv=None, socoCV=False):
    B, L, nvars = x.shape
    d = params["enc_w"].shape[0]
    patch_len = params["conv_w"].shape[1]
    P = L // patch_len
    flat = patch_len * nvars

    xp = x.reshape(B, P, flat)
    w_ve = jnp.transpose(params["conv_w"].reshape(d, flat))
    u = xp @ w_ve + params["conv_b"]
    f = u @ params["enc_w"].T + params["enc_b"]

    w_ih, w_hh = params["w_ih"].T, params["w_hh"].T
    b = params["b_ih"] + params["b_hh"]
    if socoCV:
        h0 = SOCocv @ params["le_w"].T + params["le_b"]
    else:
        h0 = jnp.zeros((B, d), jnp.float32)

    def step(carry, x_t):
        h, c = carry
        gates = x_t @ w_ih + h @ w_hh + b
        i_g, f_g, g_g, o_g = jnp.split(gates, 4, axis=-1)
        c = jax.nn.sigmoid(f_g) * c + jax.nn.sigmoid(i_g) * jnp.tanh(g_g)
        h = jax.nn.sigmoid(o_g) * jnp.tanh(c)
        return (h, c), h

    (_, _), hs = lax.scan(step, (h0, jnp.zeros_like(h0)), jnp.swapaxes(f, 0, 1))
    z = jnp.swapaxes(hs, 0, 1)
    return jax.nn.sigmoid(z @ params["fc_w"].T + params["fc_b"])[..., 0]


# ---------------------------------------------------------------------------
# Deterministic parameter init (shapes per the PyTorch __init__).
# ---------------------------------------------------------------------------
def init_params(key, d_model, patch_len, nvars=3):
    ks = jax.random.split(key, 12)
    n = lambda k, s: (0.1 * jax.random.normal(k, s, dtype=jnp.float32))
    return {
        "conv_w": n(ks[0], (d_model, patch_len, 1, nvars)),   # Conv2d weight
        "conv_b": n(ks[1], (d_model,)),
        "enc_w": n(ks[2], (d_model, d_model)),                # Linear(d_model, d_model)
        "enc_b": n(ks[3], (d_model,)),
        "w_ih": n(ks[4], (4 * d_model, d_model)),             # LSTM weight_ih_l0 (i,f,g,o packed)
        "w_hh": n(ks[5], (4 * d_model, d_model)),             # LSTM weight_hh_l0
        "b_ih": n(ks[6], (4 * d_model,)),
        "b_hh": n(ks[7], (4 * d_model,)),
        "fc_w": n(ks[8], (1, d_model)),                       # Linear(d_model, 1)
        "fc_b": n(ks[9], (1,)),
        "le_w": n(ks[10], (d_model, 1)),                      # lstm_embedding Linear(1, d_model)
        "le_b": n(ks[11], (d_model,)),
    }
    # TODO(synk): self.norm (LayerNorm) is defined but unused in the PyTorch forward -> omitted.
    # TODO(synk): padding_patch branch (ReplicationPad1d) is dead since stride == patch_len -> omitted.


if __name__ == "__main__":
    d_model, patch_len, context_length, nvars, B = 32, 4, 32, 3, 2

    key = jax.random.PRNGKey(0)
    kp, kx, ks = jax.random.split(key, 3)
    params = init_params(kp, d_model, patch_len, nvars)
    x = jax.random.normal(kx, (B, context_length, nvars), dtype=jnp.float32)
    SOCocv = jax.random.normal(ks, (B, 1), dtype=jnp.float32)

    # SOCOCV=False path (matches the default module configuration)
    out = jax.block_until_ready(pmtn_forward(x, params, SOCocv, socoCV=False))
    ref = jax.block_until_ready(pmtn_reference(x, params, SOCocv, socoCV=False))
    assert out.shape == (B, context_length // patch_len)
    assert jnp.allclose(out, ref, atol=2e-3), "mismatch vs reference (socoCV=False)"

    # SOCOCV=True path (h0 from lstm_embedding) -- same kernel, different h0
    out2 = jax.block_until_ready(pmtn_forward(x, params, SOCocv, socoCV=True))
    ref2 = jax.block_until_ready(pmtn_reference(x, params, SOCocv, socoCV=True))
    assert jnp.allclose(out2, ref2, atol=2e-3), "mismatch vs reference (socoCV=True)"

    print("KERNEL_OK")
</pallas_src>

<mosaic_0001>
module attributes {stable_mosaic.version = 11 : i64} {
  func.func @_pmtn_kernel(%arg0: i32, %arg1: memref<16x12xf32, #tpu.memory_space<vmem>>, %arg2: memref<12x32xf32, #tpu.memory_space<vmem>>, %arg3: memref<1x32xf32, #tpu.memory_space<vmem>>, %arg4: memref<32x32xf32, #tpu.memory_space<vmem>>, %arg5: memref<1x32xf32, #tpu.memory_space<vmem>>, %arg6: memref<32x128xf32, #tpu.memory_space<vmem>>, %arg7: memref<32x128xf32, #tpu.memory_space<vmem>>, %arg8: memref<1x128xf32, #tpu.memory_space<vmem>>, %arg9: memref<1x32xf32, #tpu.memory_space<vmem>>, %arg10: memref<1x1xf32, #tpu.memory_space<vmem>>, %arg11: memref<2x32xf32, #tpu.memory_space<vmem>>, %arg12: memref<2x8xf32, #tpu.memory_space<vmem>>) attributes {dimension_semantics = [#tpu.dimension_semantics<arbitrary>], iteration_bounds = array<i64: 1>, scalar_prefetch = 0 : i64, scratch_operands = 0 : i64, tpu.core_type = #tpu.core_type<tc>, window_params = [{pipeline_mode = #tpu.pipeline_mode<synchronous>, transform_indices = @transform_0, window_bounds = array<i64: 16, 12>}, {pipeline_mode = #tpu.pipeline_mode<synchronous>, transform_indices = @transform_1, window_bounds = array<i64: 12, 32>}, {pipeline_mode = #tpu.pipeline_mode<synchronous>, transform_indices = @transform_2, window_bounds = array<i64: 1, 32>}, {pipeline_mode = #tpu.pipeline_mode<synchronous>, transform_indices = @transform_3, window_bounds = array<i64: 32, 32>}, {pipeline_mode = #tpu.pipeline_mode<synchronous>, transform_indices = @transform_4, window_bounds = array<i64: 1, 32>}, {pipeline_mode = #tpu.pipeline_mode<synchronous>, transform_indices = @transform_5, window_bounds = array<i64: 32, 128>}, {pipeline_mode = #tpu.pipeline_mode<synchronous>, transform_indices = @transform_6, window_bounds = array<i64: 32, 128>}, {pipeline_mode = #tpu.pipeline_mode<synchronous>, transform_indices = @transform_7, window_bounds = array<i64: 1, 128>}, {pipeline_mode = #tpu.pipeline_mode<synchronous>, transform_indices = @transform_8, window_bounds = array<i64: 1, 32>}, {pipeline_mode = #tpu.pipeline_mode<synchronous>, transform_indices = @transform_9, window_bounds = array<i64: 1, 1>}, {pipeline_mode = #tpu.pipeline_mode<synchronous>, transform_indices = @transform_10, window_bounds = array<i64: 2, 32>}, {pipeline_mode = #tpu.pipeline_mode<synchronous>, transform_indices = @transform_11, window_bounds = array<i64: 2, 8>}]} {
    %c0 = arith.constant 0 : index
    %c0_0 = arith.constant 0 : index
    %0 = vector.load %arg1[%c0, %c0_0] : memref<16x12xf32, #tpu.memory_space<vmem>>, vector<16x12xf32>
    %c0_1 = arith.constant 0 : index
    %c0_2 = arith.constant 0 : index
    %1 = vector.load %arg2[%c0_1, %c0_2] : memref<12x32xf32, #tpu.memory_space<vmem>>, vector<12x32xf32>
    %cst = arith.constant dense<0.000000e+00> : vector<16x32xf32>
    %2 = tpu.matmul %0, %1, %cst {dimension_numbers = #tpu.dot_dimension_numbers<[1], [0], [0], [1], [0, 0, 1, 1], [], []>} : vector<16x12xf32>, vector<12x32xf32>, vector<16x32xf32> -> vector<16x32xf32>
    %c0_3 = arith.constant 0 : index
    %c0_4 = arith.constant 0 : index
    %3 = vector.load %arg3[%c0_3, %c0_4] : memref<1x32xf32, #tpu.memory_space<vmem>>, vector<1x32xf32>
    %4 = vector.broadcast %3 : vector<1x32xf32> to vector<16x32xf32>
    %5 = arith.addf %2, %4 : vector<16x32xf32>
    %c0_5 = arith.constant 0 : index
    %c0_6 = arith.constant 0 : index
    %6 = vector.load %arg4[%c0_5, %c0_6] : memref<32x32xf32, #tpu.memory_space<vmem>>, vector<32x32xf32>
    %cst_7 = arith.constant dense<0.000000e+00> : vector<16x32xf32>
    %7 = tpu.matmul %5, %6, %cst_7 {dimension_numbers = #tpu.dot_dimension_numbers<[1], [0], [0], [1], [0, 0, 1, 1], [], []>} : vector<16x32xf32>, vector<32x32xf32>, vector<16x32xf32> -> vector<16x32xf32>
    %c0_8 = arith.constant 0 : index
    %c0_9 = arith.constant 0 : index
    %8 = vector.load %arg5[%c0_8, %c0_9] : memref<1x32xf32, #tpu.memory_space<vmem>>, vector<1x32xf32>
    %9 = vector.broadcast %8 : vector<1x32xf32> to vector<16x32xf32>
    %10 = arith.addf %7, %9 : vector<16x32xf32>
    %c0_10 = arith.constant 0 : index
    %c0_11 = arith.constant 0 : index
    %11 = vector.load %arg6[%c0_10, %c0_11] : memref<32x128xf32, #tpu.memory_space<vmem>>, vector<32x128xf32>
    %cst_12 = arith.constant dense<0.000000e+00> : vector<16x128xf32>
    %12 = tpu.matmul %10, %11, %cst_12 {dimension_numbers = #tpu.dot_dimension_numbers<[1], [0], [0], [1], [0, 0, 1, 1], [], []>} : vector<16x32xf32>, vector<32x128xf32>, vector<16x128xf32> -> vector<16x128xf32>
    %c0_13 = arith.constant 0 : index
    %c0_14 = arith.constant 0 : index
    %13 = vector.load %arg8[%c0_13, %c0_14] : memref<1x128xf32, #tpu.memory_space<vmem>>, vector<1x128xf32>
    %14 = vector.broadcast %13 : vector<1x128xf32> to vector<16x128xf32>
    %15 = arith.addf %12, %14 : vector<16x128xf32>
    %c0_15 = arith.constant 0 : index
    %c0_16 = arith.constant 0 : index
    %16 = vector.load %arg7[%c0_15, %c0_16] : memref<32x128xf32, #tpu.memory_space<vmem>>, vector<32x128xf32>
    %c0_17 = arith.constant 0 : index
    %c0_18 = arith.constant 0 : index
    %17 = vector.load %arg9[%c0_17, %c0_18] : memref<1x32xf32, #tpu.memory_space<vmem>>, vector<1x32xf32>
    %c0_19 = arith.constant 0 : index
    %c0_20 = arith.constant 0 : index
    %18 = vector.load %arg10[%c0_19, %c0_20] : memref<1x1xf32, #tpu.memory_space<vmem>>, vector<1x1xf32>
    %c0_21 = arith.constant 0 : index
    %c0_22 = arith.constant 0 : index
    %19 = vector.load %arg11[%c0_21, %c0_22] : memref<2x32xf32, #tpu.memory_space<vmem>>, vector<2x32xf32>
    %cst_23 = arith.constant 0.000000e+00 : f32
    %20 = vector.broadcast %cst_23 : f32 to vector<2x32xf32>
    %21 = vector.extract_strided_slice %15 {offsets = [0, 0], sizes = [2, 128], strides = [1, 1]} : vector<16x128xf32> to vector<2x128xf32>
    %cst_24 = arith.constant dense<0.000000e+00> : vector<2x128xf32>
    %22 = tpu.matmul %19, %16, %cst_24 {dimension_numbers = #tpu.dot_dimension_numbers<[1], [0], [0], [1], [0, 0, 1, 1], [], []>} : vector<2x32xf32>, vector<32x128xf32>, vector<2x128xf32> -> vector<2x128xf32>
    %23 = arith.addf %21, %22 : vector<2x128xf32>
    %24 = vector.extract_strided_slice %23 {offsets = [0, 0], sizes = [2, 32], strides = [1, 1]} : vector<2x128xf32> to vector<2x32xf32>
    %25 = vector.extract_strided_slice %23 {offsets = [0, 32], sizes = [2, 32], strides = [1, 1]} : vector<2x128xf32> to vector<2x32xf32>
    %26 = vector.extract_strided_slice %23 {offsets = [0, 64], sizes = [2, 32], strides = [1, 1]} : vector<2x128xf32> to vector<2x32xf32>
    %27 = vector.extract_strided_slice %23 {offsets = [0, 96], sizes = [2, 32], strides = [1, 1]} : vector<2x128xf32> to vector<2x32xf32>
    %28 = arith.negf %25 : vector<2x32xf32>
    %29 = math.exp %28 : vector<2x32xf32>
    %cst_25 = arith.constant 1.000000e+00 : f32
    %30 = vector.broadcast %cst_25 : f32 to vector<2x32xf32>
    %31 = arith.addf %30, %29 : vector<2x32xf32>
    %32 = arith.divf %30, %31 : vector<2x32xf32>
    %33 = arith.mulf %32, %20 : vector<2x32xf32>
    %34 = arith.negf %24 : vector<2x32xf32>
    %35 = math.exp %34 : vector<2x32xf32>
    %cst_26 = arith.constant 1.000000e+00 : f32
    %36 = vector.broadcast %cst_26 : f32 to vector<2x32xf32>
    %37 = arith.addf %36, %35 : vector<2x32xf32>
    %38 = arith.divf %36, %37 : vector<2x32xf32>
    %39 = math.tanh %26 : vector<2x32xf32>
    %40 = arith.mulf %38, %39 : vector<2x32xf32>
    %41 = arith.addf %33, %40 : vector<2x32xf32>
    %42 = arith.negf %27 : vector<2x32xf32>
    %43 = math.exp %42 : vector<2x32xf32>
    %cst_27 = arith.constant 1.000000e+00 : f32
    %44 = vector.broadcast %cst_27 : f32 to vector<2x32xf32>
    %45 = arith.addf %44, %43 : vector<2x32xf32>
    %46 = arith.divf %44, %45 : vector<2x32xf32>
    %47 = math.tanh %41 : vector<2x32xf32>
    %48 = arith.mulf %46, %47 : vector<2x32xf32>
    %49 = vector.broadcast %17 : vector<1x32xf32> to vector<2x32xf32>
    %50 = arith.mulf %48, %49 : vector<2x32xf32>
    %cst_28 = arith.constant dense<0.000000e+00> : vector<2xf32>
    %51 = vector.multi_reduction <add>, %50, %cst_28 [1] : vector<2x32xf32> to vector<2xf32>
    %52 = vector.shape_cast %51 : vector<2xf32> to vector<2x1xf32>
    %53 = vector.broadcast %18 : vector<1x1xf32> to vector<2x1xf32>
    %54 = arith.addf %52, %53 : vector<2x1xf32>
    %55 = vector.extract_strided_slice %15 {offsets = [2, 0], sizes = [2, 128], strides = [1, 1]} : vector<16x128xf32> to vector<2x128xf32>
    %cst_29 = arith.constant dense<0.000000e+00> : vector<2x128xf32>
    %56 = tpu.matmul %48, %16, %cst_29 {dimension_numbers = #tpu.dot_dimension_numbers<[1], [0], [0], [1], [0, 0, 1, 1], [], []>} : vector<2x32xf32>, vector<32x128xf32>, vector<2x128xf32> -> vector<2x128xf32>
    %57 = arith.addf %55, %56 : vector<2x128xf32>
    %58 = vector.extract_strided_slice %57 {offsets = [0, 0], sizes = [2, 32], strides = [1, 1]} : vector<2x128xf32> to vector<2x32xf32>
    %59 = vector.extract_strided_slice %57 {offsets = [0, 32], sizes = [2, 32], strides = [1, 1]} : vector<2x128xf32> to vector<2x32xf32>
    %60 = vector.extract_strided_slice %57 {offsets = [0, 64], sizes = [2, 32], strides = [1, 1]} : vector<2x128xf32> to vector<2x32xf32>
    %61 = vector.extract_strided_slice %57 {offsets = [0, 96], sizes = [2, 32], strides = [1, 1]} : vector<2x128xf32> to vector<2x32xf32>
    %62 = arith.negf %59 : vector<2x32xf32>
    %63 = math.exp %62 : vector<2x32xf32>
    %cst_30 = arith.constant 1.000000e+00 : f32
    %64 = vector.broadcast %cst_30 : f32 to vector<2x32xf32>
    %65 = arith.addf %64, %63 : vector<2x32xf32>
    %66 = arith.divf %64, %65 : vector<2x32xf32>
    %67 = arith.mulf %66, %41 : vector<2x32xf32>
    %68 = arith.negf %58 : vector<2x32xf32>
    %69 = math.exp %68 : vector<2x32xf32>
    %cst_31 = arith.constant 1.000000e+00 : f32
    %70 = vector.broadcast %cst_31 : f32 to vector<2x32xf32>
    %71 = arith.addf %70, %69 : vector<2x32xf32>
    %72 = arith.divf %70, %71 : vector<2x32xf32>
    %73 = math.tanh %60 : vector<2x32xf32>
    %74 = arith.mulf %72, %73 : vector<2x32xf32>
    %75 = arith.addf %67, %74 : vector<2x32xf32>
    %76 = arith.negf %61 : vector<2x32xf32>
    %77 = math.exp %76 : vector<2x32xf32>
    %cst_32 = arith.constant 1.000000e+00 : f32
    %78 = vector.broadcast %cst_32 : f32 to vector<2x32xf32>
    %79 = arith.addf %78, %77 : vector<2x32xf32>
    %80 = arith.divf %78, %79 : vector<2x32xf32>
    %81 = math.tanh %75 : vector<2x32xf32>
    %82 = arith.mulf %80, %81 : vector<2x32xf32>
    %83 = vector.broadcast %17 : vector<1x32xf32> to vector<2x32xf32>
    %84 = arith.mulf %82, %83 : vector<2x32xf32>
    %cst_33 = arith.constant dense<0.000000e+00> : vector<2xf32>
    %85 = vector.multi_reduction <add>, %84, %cst_33 [1] : vector<2x32xf32> to vector<2xf32>
    %86 = vector.shape_cast %85 : vector<2xf32> to vector<2x1xf32>
    %87 = vector.broadcast %18 : vector<1x1xf32> to vector<2x1xf32>
    %88 = arith.addf %86, %87 : vector<2x1xf32>
    %89 = vector.extract_strided_slice %15 {offsets = [4, 0], sizes = [2, 128], strides = [1, 1]} : vector<16x128xf32> to vector<2x128xf32>
    %cst_34 = arith.constant dense<0.000000e+00> : vector<2x128xf32>
    %90 = tpu.matmul %82, %16, %cst_34 {dimension_numbers = #tpu.dot_dimension_numbers<[1], [0], [0], [1], [0, 0, 1, 1], [], []>} : vector<2x32xf32>, vector<32x128xf32>, vector<2x128xf32> -> vector<2x128xf32>
    %91 = arith.addf %89, %90 : vector<2x128xf32>
    %92 = vector.extract_strided_slice %91 {offsets = [0, 0], sizes = [2, 32], strides = [1, 1]} : vector<2x128xf32> to vector<2x32xf32>
    %93 = vector.extract_strided_slice %91 {offsets = [0, 32], sizes = [2, 32], strides = [1, 1]} : vector<2x128xf32> to vector<2x32xf32>
    %94 = vector.extract_strided_slice %91 {offsets = [0, 64], sizes = [2, 32], strides = [1, 1]} : vector<2x128xf32> to vector<2x32xf32>
    %95 = vector.extract_strided_slice %91 {offsets = [0, 96], sizes = [2, 32], strides = [1, 1]} : vector<2x128xf32> to vector<2x32xf32>
    %96 = arith.negf %93 : vector<2x32xf32>
    %97 = math.exp %96 : vector<2x32xf32>
    %cst_35 = arith.constant 1.000000e+00 : f32
    %98 = vector.broadcast %cst_35 : f32 to vector<2x32xf32>
    %99 = arith.addf %98, %97 : vector<2x32xf32>
    %100 = arith.divf %98, %99 : vector<2x32xf32>
    %101 = arith.mulf %100, %75 : vector<2x32xf32>
    %102 = arith.negf %92 : vector<2x32xf32>
    %103 = math.exp %102 : vector<2x32xf32>
    %cst_36 = arith.constant 1.000000e+00 : f32
    %104 = vector.broadcast %cst_36 : f32 to vector<2x32xf32>
    %105 = arith.addf %104, %103 : vector<2x32xf32>
    %106 = arith.divf %104, %105 : vector<2x32xf32>
    %107 = math.tanh %94 : vector<2x32xf32>
    %108 = arith.mulf %106, %107 : vector<2x32xf32>
    %109 = arith.addf %101, %108 : vector<2x32xf32>
    %110 = arith.negf %95 : vector<2x32xf32>
    %111 = math.exp %110 : vector<2x32xf32>
    %cst_37 = arith.constant 1.000000e+00 : f32
    %112 = vector.broadcast %cst_37 : f32 to vector<2x32xf32>
    %113 = arith.addf %112, %111 : vector<2x32xf32>
    %114 = arith.divf %112, %113 : vector<2x32xf32>
    %115 = math.tanh %109 : vector<2x32xf32>
    %116 = arith.mulf %114, %115 : vector<2x32xf32>
    %117 = vector.broadcast %17 : vector<1x32xf32> to vector<2x32xf32>
    %118 = arith.mulf %116, %117 : vector<2x32xf32>
    %cst_38 = arith.constant dense<0.000000e+00> : vector<2xf32>
    %119 = vector.multi_reduction <add>, %118, %cst_38 [1] : vector<2x32xf32> to vector<2xf32>
    %120 = vector.shape_cast %119 : vector<2xf32> to vector<2x1xf32>
    %121 = vector.broadcast %18 : vector<1x1xf32> to vector<2x1xf32>
    %122 = arith.addf %120, %121 : vector<2x1xf32>
    %123 = vector.extract_strided_slice %15 {offsets = [6, 0], sizes = [2, 128], strides = [1, 1]} : vector<16x128xf32> to vector<2x128xf32>
    %cst_39 = arith.constant dense<0.000000e+00> : vector<2x128xf32>
    %124 = tpu.matmul %116, %16, %cst_39 {dimension_numbers = #tpu.dot_dimension_numbers<[1], [0], [0], [1], [0, 0, 1, 1], [], []>} : vector<2x32xf32>, vector<32x128xf32>, vector<2x128xf32> -> vector<2x128xf32>
    %125 = arith.addf %123, %124 : vector<2x128xf32>
    %126 = vector.extract_strided_slice %125 {offsets = [0, 0], sizes = [2, 32], strides = [1, 1]} : vector<2x128xf32> to vector<2x32xf32>
    %127 = vector.extract_strided_slice %125 {offsets = [0, 32], sizes = [2, 32], strides = [1, 1]} : vector<2x128xf32> to vector<2x32xf32>
    %128 = vector.extract_strided_slice %125 {offsets = [0, 64], sizes = [2, 32], strides = [1, 1]} : vector<2x128xf32> to vector<2x32xf32>
    %129 = vector.extract_strided_slice %125 {offsets = [0, 96], sizes = [2, 32], strides = [1, 1]} : vector<2x128xf32> to vector<2x32xf32>
    %130 = arith.negf %127 : vector<2x32xf32>
    %131 = math.exp %130 : vector<2x32xf32>
    %cst_40 = arith.constant 1.000000e+00 : f32
    %132 = vector.broadcast %cst_40 : f32 to vector<2x32xf32>
    %133 = arith.addf %132, %131 : vector<2x32xf32>
    %134 = arith.divf %132, %133 : vector<2x32xf32>
    %135 = arith.mulf %134, %109 : vector<2x32xf32>
    %136 = arith.negf %126 : vector<2x32xf32>
    %137 = math.exp %136 : vector<2x32xf32>
    %cst_41 = arith.constant 1.000000e+00 : f32
    %138 = vector.broadcast %cst_41 : f32 to vector<2x32xf32>
    %139 = arith.addf %138, %137 : vector<2x32xf32>
    %140 = arith.divf %138, %139 : vector<2x32xf32>
    %141 = math.tanh %128 : vector<2x32xf32>
    %142 = arith.mulf %140, %141 : vector<2x32xf32>
    %143 = arith.addf %135, %142 : vector<2x32xf32>
    %144 = arith.negf %129 : vector<2x32xf32>
    %145 = math.exp %144 : vector<2x32xf32>
    %cst_42 = arith.constant 1.000000e+00 : f32
    %146 = vector.broadcast %cst_42 : f32 to vector<2x32xf32>
    %147 = arith.addf %146, %145 : vector<2x32xf32>
    %148 = arith.divf %146, %147 : vector<2x32xf32>
    %149 = math.tanh %143 : vector<2x32xf32>
    %150 = arith.mulf %148, %149 : vector<2x32xf32>
    %151 = vector.broadcast %17 : vector<1x32xf32> to vector<2x32xf32>
    %152 = arith.mulf %150, %151 : vector<2x32xf32>
    %cst_43 = arith.constant dense<0.000000e+00> : vector<2xf32>
    %153 = vector.multi_reduction <add>, %152, %cst_43 [1] : vector<2x32xf32> to vector<2xf32>
    %154 = vector.shape_cast %153 : vector<2xf32> to vector<2x1xf32>
    %155 = vector.broadcast %18 : vector<1x1xf32> to vector<2x1xf32>
    %156 = arith.addf %154, %155 : vector<2x1xf32>
    %157 = vector.extract_strided_slice %15 {offsets = [8, 0], sizes = [2, 128], strides = [1, 1]} : vector<16x128xf32> to vector<2x128xf32>
    %cst_44 = arith.constant dense<0.000000e+00> : vector<2x128xf32>
    %158 = tpu.matmul %150, %16, %cst_44 {dimension_numbers = #tpu.dot_dimension_numbers<[1], [0], [0], [1], [0, 0, 1, 1], [], []>} : vector<2x32xf32>, vector<32x128xf32>, vector<2x128xf32> -> vector<2x128xf32>
    %159 = arith.addf %157, %158 : vector<2x128xf32>
    %160 = vector.extract_strided_slice %159 {offsets = [0, 0], sizes = [2, 32], strides = [1, 1]} : vector<2x128xf32> to vector<2x32xf32>
    %161 = vector.extract_strided_slice %159 {offsets = [0, 32], sizes = [2, 32], strides = [1, 1]} : vector<2x128xf32> to vector<2x32xf32>
    %162 = vector.extract_strided_slice %159 {offsets = [0, 64], sizes = [2, 32], strides = [1, 1]} : vector<2x128xf32> to vector<2x32xf32>
    %163 = vector.extract_strided_slice %159 {offsets = [0, 96], sizes = [2, 32], strides = [1, 1]} : vector<2x128xf32> to vector<2x32xf32>
    %164 = arith.negf %161 : vector<2x32xf32>
    %165 = math.exp %164 : vector<2x32xf32>
    %cst_45 = arith.constant 1.000000e+00 : f32
    %166 = vector.broadcast %cst_45 : f32 to vector<2x32xf32>
    %167 = arith.addf %166, %165 : vector<2x32xf32>
    %168 = arith.divf %166, %167 : vector<2x32xf32>
    %169 = arith.mulf %168, %143 : vector<2x32xf32>
    %170 = arith.negf %160 : vector<2x32xf32>
    %171 = math.exp %170 : vector<2x32xf32>
    %cst_46 = arith.constant 1.000000e+00 : f32
    %172 = vector.broadcast %cst_46 : f32 to vector<2x32xf32>
    %173 = arith.addf %172, %171 : vector<2x32xf32>
    %174 = arith.divf %172, %173 : vector<2x32xf32>
    %175 = math.tanh %162 : vector<2x32xf32>
    %176 = arith.mulf %174, %175 : vector<2x32xf32>
    %177 = arith.addf %169, %176 : vector<2x32xf32>
    %178 = arith.negf %163 : vector<2x32xf32>
    %179 = math.exp %178 : vector<2x32xf32>
    %cst_47 = arith.constant 1.000000e+00 : f32
    %180 = vector.broadcast %cst_47 : f32 to vector<2x32xf32>
    %181 = arith.addf %180, %179 : vector<2x32xf32>
    %182 = arith.divf %180, %181 : vector<2x32xf32>
    %183 = math.tanh %177 : vector<2x32xf32>
    %184 = arith.mulf %182, %183 : vector<2x32xf32>
    %185 = vector.broadcast %17 : vector<1x32xf32> to vector<2x32xf32>
    %186 = arith.mulf %184, %185 : vector<2x32xf32>
    %cst_48 = arith.constant dense<0.000000e+00> : vector<2xf32>
    %187 = vector.multi_reduction <add>, %186, %cst_48 [1] : vector<2x32xf32> to vector<2xf32>
    %188 = vector.shape_cast %187 : vector<2xf32> to vector<2x1xf32>
    %189 = vector.broadcast %18 : vector<1x1xf32> to vector<2x1xf32>
    %190 = arith.addf %188, %189 : vector<2x1xf32>
    %191 = vector.extract_strided_slice %15 {offsets = [10, 0], sizes = [2, 128], strides = [1, 1]} : vector<16x128xf32> to vector<2x128xf32>
    %cst_49 = arith.constant dense<0.000000e+00> : vector<2x128xf32>
    %192 = tpu.matmul %184, %16, %cst_49 {dimension_numbers = #tpu.dot_dimension_numbers<[1], [0], [0], [1], [0, 0, 1, 1], [], []>} : vector<2x32xf32>, vector<32x128xf32>, vector<2x128xf32> -> vector<2x128xf32>
    %193 = arith.addf %191, %192 : vector<2x128xf32>
    %194 = vector.extract_strided_slice %193 {offsets = [0, 0], sizes = [2, 32], strides = [1, 1]} : vector<2x128xf32> to vector<2x32xf32>
    %195 = vector.extract_strided_slice %193 {offsets = [0, 32], sizes = [2, 32], strides = [1, 1]} : vector<2x128xf32> to vector<2x32xf32>
    %196 = vector.extract_strided_slice %193 {offsets = [0, 64], sizes = [2, 32], strides = [1, 1]} : vector<2x128xf32> to vector<2x32xf32>
    %197 = vector.extract_strided_slice %193 {offsets = [0, 96], sizes = [2, 32], strides = [1, 1]} : vector<2x128xf32> to vector<2x32xf32>
    %198 = arith.negf %195 : vector<2x32xf32>
    %199 = math.exp %198 : vector<2x32xf32>
    %cst_50 = arith.constant 1.000000e+00 : f32
    %200 = vector.broadcast %cst_50 : f32 to vector<2x32xf32>
    %201 = arith.addf %200, %199 : vector<2x32xf32>
    %202 = arith.divf %200, %201 : vector<2x32xf32>
    %203 = arith.mulf %202, %177 : vector<2x32xf32>
    %204 = arith.negf %194 : vector<2x32xf32>
    %205 = math.exp %204 : vector<2x32xf32>
    %cst_51 = arith.constant 1.000000e+00 : f32
    %206 = vector.broadcast %cst_51 : f32 to vector<2x32xf32>
    %207 = arith.addf %206, %205 : vector<2x32xf32>
    %208 = arith.divf %206, %207 : vector<2x32xf32>
    %209 = math.tanh %196 : vector<2x32xf32>
    %210 = arith.mulf %208, %209 : vector<2x32xf32>
    %211 = arith.addf %203, %210 : vector<2x32xf32>
    %212 = arith.negf %197 : vector<2x32xf32>
    %213 = math.exp %212 : vector<2x32xf32>
    %cst_52 = arith.constant 1.000000e+00 : f32
    %214 = vector.broadcast %cst_52 : f32 to vector<2x32xf32>
    %215 = arith.addf %214, %213 : vector<2x32xf32>
    %216 = arith.divf %214, %215 : vector<2x32xf32>
    %217 = math.tanh %211 : vector<2x32xf32>
    %218 = arith.mulf %216, %217 : vector<2x32xf32>
    %219 = vector.broadcast %17 : vector<1x32xf32> to vector<2x32xf32>
    %220 = arith.mulf %218, %219 : vector<2x32xf32>
    %cst_53 = arith.constant dense<0.000000e+00> : vector<2xf32>
    %221 = vector.multi_reduction <add>, %220, %cst_53 [1] : vector<2x32xf32> to vector<2xf32>
    %222 = vector.shape_cast %221 : vector<2xf32> to vector<2x1xf32>
    %223 = vector.broadcast %18 : vector<1x1xf32> to vector<2x1xf32>
    %224 = arith.addf %222, %223 : vector<2x1xf32>
    %225 = vector.extract_strided_slice %15 {offsets = [12, 0], sizes = [2, 128], strides = [1, 1]} : vector<16x128xf32> to vector<2x128xf32>
    %cst_54 = arith.constant dense<0.000000e+00> : vector<2x128xf32>
    %226 = tpu.matmul %218, %16, %cst_54 {dimension_numbers = #tpu.dot_dimension_numbers<[1], [0], [0], [1], [0, 0, 1, 1], [], []>} : vector<2x32xf32>, vector<32x128xf32>, vector<2x128xf32> -> vector<2x128xf32>
    %227 = arith.addf %225, %226 : vector<2x128xf32>
    %228 = vector.extract_strided_slice %227 {offsets = [0, 0], sizes = [2, 32], strides = [1, 1]} : vector<2x128xf32> to vector<2x32xf32>
    %229 = vector.extract_strided_slice %227 {offsets = [0, 32], sizes = [2, 32], strides = [1, 1]} : vector<2x128xf32> to vector<2x32xf32>
    %230 = vector.extract_strided_slice %227 {offsets = [0, 64], sizes = [2, 32], strides = [1, 1]} : vector<2x128xf32> to vector<2x32xf32>
    %231 = vector.extract_strided_slice %227 {offsets = [0, 96], sizes = [2, 32], strides = [1, 1]} : vector<2x128xf32> to vector<2x32xf32>
    %232 = arith.negf %229 : vector<2x32xf32>
    %233 = math.exp %232 : vector<2x32xf32>
    %cst_55 = arith.constant 1.000000e+00 : f32
    %234 = vector.broadcast %cst_55 : f32 to vector<2x32xf32>
    %235 = arith.addf %234, %233 : vector<2x32xf32>
    %236 = arith.divf %234, %235 : vector<2x32xf32>
    %237 = arith.mulf %236, %211 : vector<2x32xf32>
    %238 = arith.negf %228 : vector<2x32xf32>
    %239 = math.exp %238 : vector<2x32xf32>
    %cst_56 = arith.constant 1.000000e+00 : f32
    %240 = vector.broadcast %cst_56 : f32 to vector<2x32xf32>
    %241 = arith.addf %240, %239 : vector<2x32xf32>
    %242 = arith.divf %240, %241 : vector<2x32xf32>
    %243 = math.tanh %230 : vector<2x32xf32>
    %244 = arith.mulf %242, %243 : vector<2x32xf32>
    %245 = arith.addf %237, %244 : vector<2x32xf32>
    %246 = arith.negf %231 : vector<2x32xf32>
    %247 = math.exp %246 : vector<2x32xf32>
    %cst_57 = arith.constant 1.000000e+00 : f32
    %248 = vector.broadcast %cst_57 : f32 to vector<2x32xf32>
    %249 = arith.addf %248, %247 : vector<2x32xf32>
    %250 = arith.divf %248, %249 : vector<2x32xf32>
    %251 = math.tanh %245 : vector<2x32xf32>
    %252 = arith.mulf %250, %251 : vector<2x32xf32>
    %253 = vector.broadcast %17 : vector<1x32xf32> to vector<2x32xf32>
    %254 = arith.mulf %252, %253 : vector<2x32xf32>
    %cst_58 = arith.constant dense<0.000000e+00> : vector<2xf32>
    %255 = vector.multi_reduction <add>, %254, %cst_58 [1] : vector<2x32xf32> to vector<2xf32>
    %256 = vector.shape_cast %255 : vector<2xf32> to vector<2x1xf32>
    %257 = vector.broadcast %18 : vector<1x1xf32> to vector<2x1xf32>
    %258 = arith.addf %256, %257 : vector<2x1xf32>
    %259 = vector.extract_strided_slice %15 {offsets = [14, 0], sizes = [2, 128], strides = [1, 1]} : vector<16x128xf32> to vector<2x128xf32>
    %cst_59 = arith.constant dense<0.000000e+00> : vector<2x128xf32>
    %260 = tpu.matmul %252, %16, %cst_59 {dimension_numbers = #tpu.dot_dimension_numbers<[1], [0], [0], [1], [0, 0, 1, 1], [], []>} : vector<2x32xf32>, vector<32x128xf32>, vector<2x128xf32> -> vector<2x128xf32>
    %261 = arith.addf %259, %260 : vector<2x128xf32>
    %262 = vector.extract_strided_slice %261 {offsets = [0, 0], sizes = [2, 32], strides = [1, 1]} : vector<2x128xf32> to vector<2x32xf32>
    %263 = vector.extract_strided_slice %261 {offsets = [0, 32], sizes = [2, 32], strides = [1, 1]} : vector<2x128xf32> to vector<2x32xf32>
    %264 = vector.extract_strided_slice %261 {offsets = [0, 64], sizes = [2, 32], strides = [1, 1]} : vector<2x128xf32> to vector<2x32xf32>
    %265 = vector.extract_strided_slice %261 {offsets = [0, 96], sizes = [2, 32], strides = [1, 1]} : vector<2x128xf32> to vector<2x32xf32>
    %266 = arith.negf %263 : vector<2x32xf32>
    %267 = math.exp %266 : vector<2x32xf32>
    %cst_60 = arith.constant 1.000000e+00 : f32
    %268 = vector.broadcast %cst_60 : f32 to vector<2x32xf32>
    %269 = arith.addf %268, %267 : vector<2x32xf32>
    %270 = arith.divf %268, %269 : vector<2x32xf32>
    %271 = arith.mulf %270, %245 : vector<2x32xf32>
    %272 = arith.negf %262 : vector<2x32xf32>
    %273 = math.exp %272 : vector<2x32xf32>
    %cst_61 = arith.constant 1.000000e+00 : f32
    %274 = vector.broadcast %cst_61 : f32 to vector<2x32xf32>
    %275 = arith.addf %274, %273 : vector<2x32xf32>
    %276 = arith.divf %274, %275 : vector<2x32xf32>
    %277 = math.tanh %264 : vector<2x32xf32>
    %278 = arith.mulf %276, %277 : vector<2x32xf32>
    %279 = arith.addf %271, %278 : vector<2x32xf32>
    %280 = arith.negf %265 : vector<2x32xf32>
    %281 = math.exp %280 : vector<2x32xf32>
    %cst_62 = arith.constant 1.000000e+00 : f32
    %282 = vector.broadcast %cst_62 : f32 to vector<2x32xf32>
    %283 = arith.addf %282, %281 : vector<2x32xf32>
    %284 = arith.divf %282, %283 : vector<2x32xf32>
    %285 = math.tanh %279 : vector<2x32xf32>
    %286 = arith.mulf %284, %285 : vector<2x32xf32>
    %287 = vector.broadcast %17 : vector<1x32xf32> to vector<2x32xf32>
    %288 = arith.mulf %286, %287 : vector<2x32xf32>
    %cst_63 = arith.constant dense<0.000000e+00> : vector<2xf32>
    %289 = vector.multi_reduction <add>, %288, %cst_63 [1] : vector<2x32xf32> to vector<2xf32>
    %290 = vector.shape_cast %289 : vector<2xf32> to vector<2x1xf32>
    %291 = vector.broadcast %18 : vector<1x1xf32> to vector<2x1xf32>
    %292 = arith.addf %290, %291 : vector<2x1xf32>
    %293 = tpu.concatenate %54, %88, %122, %156, %190, %224, %258, %292 in 1 : vector<2x1xf32>, vector<2x1xf32>, vector<2x1xf32>, vector<2x1xf32>, vector<2x1xf32>, vector<2x1xf32>, vector<2x1xf32>, vector<2x1xf32> -> vector<2x8xf32>
    %294 = arith.negf %293 : vector<2x8xf32>
    %295 = math.exp %294 : vector<2x8xf32>
    %cst_64 = arith.constant 1.000000e+00 : f32
    %296 = vector.broadcast %cst_64 : f32 to vector<2x8xf32>
    %297 = arith.addf %296, %295 : vector<2x8xf32>
    %298 = arith.divf %296, %297 : vector<2x8xf32>
    %c0_65 = arith.constant 0 : index
    %c0_66 = arith.constant 0 : index
    %299 = vector.load %arg12[%c0_65, %c0_66] : memref<2x8xf32, #tpu.memory_space<vmem>>, vector<2x8xf32>
    tpu.vector_store %arg12[%c0_65, %c0_66], %298 {strides = array<i32>} : memref<2x8xf32, #tpu.memory_space<vmem>>, vector<2x8xf32>,
    return
  }
  func.func @transform_0(%arg0: i32) -> (i32, i32) {
    %c0_i32 = arith.constant 0 : i32
    %c0_i32_0 = arith.constant 0 : i32
    %c0_i32_1 = arith.constant 0 : i32
    return %c0_i32, %c0_i32_0 : i32, i32
  }
  func.func @transform_1(%arg0: i32) -> (i32, i32) {
    %c0_i32 = arith.constant 0 : i32
    %c0_i32_0 = arith.constant 0 : i32
    %c0_i32_1 = arith.constant 0 : i32
    return %c0_i32, %c0_i32_0 : i32, i32
  }
  func.func @transform_2(%arg0: i32) -> (i32, i32) {
    %c0_i32 = arith.constant 0 : i32
    %c0_i32_0 = arith.constant 0 : i32
    %c0_i32_1 = arith.constant 0 : i32
    return %c0_i32, %c0_i32_0 : i32, i32
  }
  func.func @transform_3(%arg0: i32) -> (i32, i32) {
    %c0_i32 = arith.constant 0 : i32
    %c0_i32_0 = arith.constant 0 : i32
    %c0_i32_1 = arith.constant 0 : i32
    return %c0_i32, %c0_i32_0 : i32, i32
  }
  func.func @transform_4(%arg0: i32) -> (i32, i32) {
    %c0_i32 = arith.constant 0 : i32
    %c0_i32_0 = arith.constant 0 : i32
    %c0_i32_1 = arith.constant 0 : i32
    return %c0_i32, %c0_i32_0 : i32, i32
  }
  func.func @transform_5(%arg0: i32) -> (i32, i32) {
    %c0_i32 = arith.constant 0 : i32
    %c0_i32_0 = arith.constant 0 : i32
    %c0_i32_1 = arith.constant 0 : i32
    return %c0_i32, %c0_i32_0 : i32, i32
  }
  func.func @transform_6(%arg0: i32) -> (i32, i32) {
    %c0_i32 = arith.constant 0 : i32
    %c0_i32_0 = arith.constant 0 : i32
    %c0_i32_1 = arith.constant 0 : i32
    return %c0_i32, %c0_i32_0 : i32, i32
  }
  func.func @transform_7(%arg0: i32) -> (i32, i32) {
    %c0_i32 = arith.constant 0 : i32
    %c0_i32_0 = arith.constant 0 : i32
    %c0_i32_1 = arith.constant 0 : i32
    return %c0_i32, %c0_i32_0 : i32, i32
  }
  func.func @transform_8(%arg0: i32) -> (i32, i32) {
    %c0_i32 = arith.constant 0 : i32
    %c0_i32_0 = arith.constant 0 : i32
    %c0_i32_1 = arith.constant 0 : i32
    return %c0_i32, %c0_i32_0 : i32, i32
  }
  func.func @transform_9(%arg0: i32) -> (i32, i32) {
    %c0_i32 = arith.constant 0 : i32
    %c0_i32_0 = arith.constant 0 : i32
    %c0_i32_1 = arith.constant 0 : i32
    return %c0_i32, %c0_i32_0 : i32, i32
  }
  func.func @transform_10(%arg0: i32) -> (i32, i32) {
    %c0_i32 = arith.constant 0 : i32
    %c0_i32_0 = arith.constant 0 : i32
    %c0_i32_1 = arith.constant 0 : i32
    return %c0_i32, %c0_i32_0 : i32, i32
  }
  func.func @transform_11(%arg0: i32) -> (i32, i32) {
    %c0_i32 = arith.constant 0 : i32
    %c0_i32_0 = arith.constant 0 : i32
    %c0_i32_1 = arith.constant 0 : i32
    return %c0_i32, %c0_i32_0 : i32, i32
  }
}

</mosaic_0001>

<bundles_post_ra>
// kernel: tpu_custom_call.1
= control target key start
LH: loop header
LB: loop body
LE: loop exit
PB: predicated region body
PF: predicated region fallthrough
CT: control target
= control target key end

     0   :  { %s2129_s0 = inlined_call_operand.hbm [shape: f32[16,12], index: 0, kind: input, shape index: {}]   ;;  %s2130_s1 = inlined_call_operand.hbm [shape: f32[12,32], index: 1, kind: input, shape index: {}]   ;;  %s2131_s2 = inlined_call_operand.vmem [shape: f32[1,32], index: 2, kind: input, shape index: {}]   ;;  %s2132_s3 = inlined_call_operand.hbm [shape: f32[32,32], index: 3, kind: input, shape index: {}]   ;;  %s2133_s4 = inlined_call_operand.vmem [shape: f32[1,32], index: 4, kind: input, shape index: {}]   ;;  %s2134_s5 = inlined_call_operand.hbm [shape: f32[32,128], index: 5, kind: input, shape index: {}]   ;;  %s2135_s6 = inlined_call_operand.hbm [shape: f32[32,128], index: 6, kind: input, shape index: {}]   ;;  %s2136_s7 = inlined_call_operand.vmem [shape: f32[1,128], index: 7, kind: input, shape index: {}]   ;;  %s2137_s8 = inlined_call_operand.vmem [shape: f32[1,32], index: 8, kind: input, shape index: {}]   ;;  %s2138_s9 = inlined_call_operand.<no memory space> [shape: f32[1,1], index: 9, kind: input, shape index: {}]   ;;  %s2139_s10 = inlined_call_operand.vmem [shape: f32[2,32], index: 10, kind: input, shape index: {}]   ;;  %s2140_s11 = inlined_call_operand.hbm [shape: f32[2,8], index: 11, kind: output, shape index: {}]  }
   0x1   :  { %v16_v0 = vstv %s2138_s9 }
   0x2   :  { %17 = vst [vmem:[#allocation2] sm:$0x1] %v16_v0 }
   0x3   :  { %18 = vsyncpa [#allocation4], 0 }
   0x4   :  { %19 = vsyncpa [#allocation7], 0 }
   0x5   :  { %20 = vsyncpa [#allocation10], 0 }
   0x6   :  { %21 = vsyncpa [#allocation5], 0  ;;  %s1821_s19 = smov [#allocation6]   ;;  %s1822_s21 = smov [#allocation9]  }
   0x7   :  { %s39_s20 = sshll.u32 %s1821_s19, 4  ;;  %s67_s22 = sshll.u32 %s1822_s21, 4  ;;  %s40_s20 = int_to_ptr.vmem [resolvable:$true] %s39_s20  ;;  %s68_s22 = int_to_ptr.vmem [resolvable:$true] %s67_s22 }
   0x8   :  { %s1701_s23 = scalar_lea.vmem %s40_s20, 256  ;;  %p1706_p1 = scmp.lt.s32.totalorder %s40_s20, %s40_s20 }
   0x9   :  { %p1702_p0 = scmp.ne.s32.totalorder %s40_s20, %s1701_s23  ;;  %p1707_p2 = scmp.lt.s32.totalorder %s1701_s23, %s1701_s23 }
   0xb   :  { %p1708_p3 = por %p1707_p2, %p1706_p1 }
   0xd   :  { %p1709_p4 = pnand %p1708_p3, %p1702_p0 }
   0xf   :  { %1712 = shalt.err (!%p1709_p4)
}
  0x10   :  { %s1823_s24 = smov 128   ;;  %s1824_s9 = smov 8  }
  0x11   :  { %45 = dma.hbm_to_vmem [thread:$0]  %s2130_s1, 256, %s40_s20, [#allocation7], %s1823_s24, %s1823_s24, %s1824_s9  }
  0x12   :  { %s1721_s27 = scalar_lea.vmem %s68_s22, 512  ;;  %p1726_p6 = scmp.lt.s32.totalorder %s68_s22, %s68_s22 }
  0x13   :  { %p1722_p5 = scmp.ne.s32.totalorder %s68_s22, %s1721_s27  ;;  %p1727_p7 = scmp.lt.s32.totalorder %s1721_s27, %s1721_s27 }
  0x15   :  { %p1728_p8 = por %p1727_p7, %p1726_p6 }
  0x17   :  { %p1729_p9 = pnand %p1728_p8, %p1722_p5 }
  0x19   :  { %1732 = shalt.err (!%p1729_p9)
}
  0x1a   :  { %73 = dma.hbm_to_vmem [thread:$0]  %s2134_s5, 512, %s68_s22, [#allocation10], %s1823_s24, %s1823_s24, %s1824_s9  }
  0x1b   :  { %s1825_s30 = smov [#allocation3]   ;;  %s1826_s13 = smov [#allocation8]  }
  0x1c   :  { %s27_s12 = sshll.u32 %s1825_s30, 4  ;;  %s53_s14 = sshll.u32 %s1826_s13, 4  ;;  %s28_s12 = int_to_ptr.vmem [resolvable:$true] %s27_s12  ;;  %s54_s14 = int_to_ptr.vmem [resolvable:$true] %s53_s14 }
  0x1d   :  { %s1741_s1 = scalar_lea.vmem %s28_s12, 256  ;;  %p1746_p11 = scmp.lt.s32.totalorder %s28_s12, %s28_s12 }
  0x1e   :  { %p1742_p10 = scmp.ne.s32.totalorder %s28_s12, %s1741_s1  ;;  %p1747_p12 = scmp.lt.s32.totalorder %s1741_s1, %s1741_s1 }
  0x20   :  { %p1748_p13 = por %p1747_p12, %p1746_p11 }
  0x22   :  { %p1749_p0 = pnand %p1748_p13, %p1742_p10 }
  0x24   :  { %1752 = shalt.err (!%p1749_p0)
}
  0x25   :  { %33 = dma.hbm_to_vmem [thread:$0]  %s2129_s0, 256, %s28_s12, [#allocation4], %s1823_s24, %s1823_s24, %s1824_s9  }
  0x26   :  { %s1761_s5 = scalar_lea.vmem %s54_s14, 512  ;;  %p1766_p2 = scmp.lt.s32.totalorder %s54_s14, %s54_s14 }
  0x27   :  { %p1762_p1 = scmp.ne.s32.totalorder %s54_s14, %s1761_s5  ;;  %p1767_p3 = scmp.lt.s32.totalorder %s1761_s5, %s1761_s5 }
  0x29   :  { %p1768_p4 = por %p1767_p3, %p1766_p2 }
  0x2b   :  { %p1769_p5 = pnand %p1768_p4, %p1762_p1 }
  0x2d   :  { %1772 = shalt.err (!%p1769_p5)
}
  0x2e   :  { %59 = dma.hbm_to_vmem [thread:$0]  %s2132_s3, 512, %s54_s14, [#allocation7], %s1823_s24, %s1823_s24, %s1824_s9  }
  0x2f   :  { %s1827_s19 = smov [#allocation11]  }
  0x30   :  { %s79_s20 = sshll.u32 %s1827_s19, 4  ;;  %s80_s20 = int_to_ptr.vmem [resolvable:$true] %s79_s20 }
  0x31   :  { %s1781_s21 = scalar_lea.vmem %s80_s20, 512  ;;  %p1786_p7 = scmp.lt.s32.totalorder %s80_s20, %s80_s20 }
  0x32   :  { %p1782_p6 = scmp.ne.s32.totalorder %s80_s20, %s1781_s21  ;;  %p1787_p8 = scmp.lt.s32.totalorder %s1781_s21, %s1781_s21 }
  0x34   :  { %p1788_p9 = por %p1787_p8, %p1786_p7 }
  0x36   :  { %p1789_p10 = pnand %p1788_p9, %p1782_p6 }
  0x38   :  { %1792 = shalt.err (!%p1789_p10)
}
  0x39   :  { %85 = dma.hbm_to_vmem [thread:$0]  %s2135_s6, 512, %s80_s20, [#allocation10], %s1823_s24, %s1823_s24, %s1824_s9  }
  0x3a   :  { %1813 = dma.done.wait [#allocation4], 256  }
  0x3b   :  { %1814 = vsyncadd [#allocation4], 4294967040 }
  0x3c   :  { %1815 = dma.done.wait [#allocation7], 768  }
  0x3d   :  { %1816 = vsyncadd [#allocation7], 4294966528 }
  0x3e   :  { %1817 = dma.done.wait [#allocation10], 1024  }
  0x3f   :  { %1818 = vsyncadd [#allocation10], 4294966272  ;;  %vm127_vm0 = vcmask 1043456   ;;  %vm120_vm1 = vcmask 97280   ;;  %v112_v1 = vld [vmem:[#allocation6 + $0x8] sm:$0xf] }
  0x40   :  { %v111_v2 = vld [vmem:[#allocation6] sm:$0xff]  ;;  %v109_v3 = vld [vmem:[#allocation3] sm:$0xff]  ;;  %1488 = vmatprep.subr.msk.mxu0 %vm127_vm0, %v112_v1  ;;  %v209_v4 = vld [vmem:[#allocation8 + $0x18] sm:$0xff]  ;;  %vm217_vm2 = vcmask 261120   ;;  %v1828_v16 = vmov 0.0   ;;  %vm1829_vm3 = vmmov 0  }
  0x41   :  { %1492 = vmatprep.mubr.msk.f32.mxu0 %vm120_vm1, %v109_v3  ;;  %1489 = vmatpush3.msk.msra.mxu0 %vm127_vm0, %v112_v1  ;;  %v110_v5 = vld [vmem:[#allocation3 + $0x8] sm:$0xff]  ;;  %v208_v6 = vld [vmem:[#allocation8 + $0x10] sm:$0xff]  ;;  %v206_v8 = vld [vmem:[#allocation8] sm:$0xff]  ;;  %s1830_s25 = smov 64   ;;  %s1832_s28 = smov 96   ;;  %vm631_vm4 = vcmask 257026  }
  0x42   :  { %1495 = vmatprep.subr.mxu1 %v209_v4  ;;  %1490 = vmatprep.subr.mxu0 %v111_v2  ;;  %v207_v7 = vld [vmem:[#allocation8 + $0x8] sm:$0xff]  ;;  %v302_v9 = vld [vmem:[#allocation9 + $0x18] sm:$0xff]  ;;  %v301_v15 = vld [vmem:[#allocation9 + $0x10] sm:$0xff]  ;;  %vm509_vm5 = vcmask 254976   ;;  %vm748_vm6 = vcmask 259076   ;;  %vm865_vm7 = vcmask 261126  }
  0x43   :  { %1496 = vmatpush3.msra.mxu1 %v209_v4  ;;  %1491 = vmatpush3.msra.mxu0 %v111_v2  ;;  %v1403_v11 = vld [vmem:[%s2131_s2] ss:$0 sm:$0xff]  ;;  %v300_v18 = vld [vmem:[#allocation9 + $0x8] sm:$0xff]  ;;  %v1944_v19 = vld [vmem:[#allocation11 + $0x10] sm:$0xff]  ;;  %s1834_s29 = smov 2   ;;  %s1835_s30 = smov 3  }
  0x44   :  { %1493 = vmatmul.mubr.msk.f32.vlgmr.msra.gmra.mxu0 %vm120_vm1, %v110_v5  ;;  %1497 = vmatprep.subr.mxu1 %v208_v6  ;;  %v1940_v17 = vld [vmem:[#allocation11 + $0x18] sm:$0xff]  ;;  %v299_v20 = vld [vmem:[#allocation9] sm:$0xff]  ;;  %v1948_v21 = vld [vmem:[#allocation11 + $0x8] sm:$0xff]  ;;  %s1836_s12 = smov 5   ;;  %s1837_s13 = smov 4   ;;  %vm1364_vm8 = vcmask 7168  }
  0x45   :  { %1498 = vmatpush3.msra.mxu1 %v208_v6  ;;  %1506 = vmatprep.subr.mxu0 %v302_v9  ;;  %v1952_v22 = vld [vmem:[#allocation11] sm:$0xff]  ;;  %v1407_v25 = vld [vmem:[%s2133_s4] ss:$0 sm:$0xff]  ;;  %s1838_s14 = smov 6   ;;  %s1839_s1 = smov 7   ;;  %vm1366_vm9 = vcmask 15360  }
  0x46   :  { %1499 = vmatprep.subr.mxu1 %v207_v7  ;;  %1507 = vmatpush3.msra.mxu0 %v302_v9  ;;  %v397_v23 = vld [vmem:[%s2139_s10] sm:$0x3]  ;;  %vm1368_vm10 = vcmask 23552   ;;  %vm1370_vm11 = vcmask 31744   ;;  %vm1372_vm12 = vcmask 39936   ;;  %vm1374_vm13 = vcmask 48128  }
  0x47   :  { %1500 = vmatpush3.msra.mxu1 %v207_v7  ;;  %1508 = vmatprep.subr.mxu0 %v301_v15  ;;  %v1410_v31 = vld [vmem:[%s2136_s7] ss:$0 sm:$0xff]  ;;  %s1831_s7 = smov 32   ;;  %vm1376_vm14 = vcmask 56320   ;;  %s1840_s15 = smov [#allocation12]   ;;  %vm1384_vm15 = vcmask 58368  }
  0x48   :  { %1501 = vmatprep.subr.mxu1 %v206_v8  ;;  %1509 = vmatpush3.msra.mxu0 %v301_v15  ;;  %s1392_s16 = sshll.u32 %s1840_s15, 4  ;;  %s1393_s16 = int_to_ptr.vmem [resolvable:$true] %s1392_s16 }
  0x49   :  { %1502 = vmatpush3.msra.mxu1 %v206_v8  ;;  %1510 = vmatprep.subr.mxu0 %v300_v18  ;;  %s1793_s5 = scalar_lea.vmem %s1393_s16, 32  ;;  %p1798_p12 = scmp.lt.s32.totalorder %s1393_s16, %s1393_s16 }
  0x4a   :  { %1517 = vmatprep.subr.mxu1 %v1828_v16  ;;  %1511 = vmatpush3.msra.mxu0 %v300_v18  ;;  %p1794_p11 = scmp.ne.s32.totalorder %s1393_s16, %s1793_s5  ;;  %p1799_p13 = scmp.lt.s32.totalorder %s1793_s5, %s1793_s5 }
  0x4b   :  { %1512 = vmatprep.subr.mxu0 %v299_v20 }
  0x4c   :  { %1513 = vmatpush3.msra.mxu0 %v299_v20  ;;  %p1800_p0 = por %p1799_p13, %p1798_p12 }
  0x4d   :  { %1528 = vmatprep.subr.mxu0 %v1828_v16 }
  0x4e   :  { %p1801_p1 = pnand %p1800_p0, %p1794_p11 }
 0x104   :  { %v1494_v10 = vpop.f32.mrf.mxu0 }
 0x105   :  { %v203_v14 = vadd.f32 %v1494_v10, %v1403_v11 }
 0x106   :  { %v197_v12 = vpop.f32.mrf.mxu0 }
 0x107   :  { %v198_v13 = vadd.f32 %v1403_v11, %v197_v12 }
 0x109   :  { %1503 = vmatprep.mubr.msk.f32.mxu1 %vm217_vm2, %v198_v13 }
 0x10a   :  { %1504 = vmatmul.mubr.msk.f32.vlgmr.msra.gmra.mxu1 %vm217_vm2, %v203_v14 }
 0x10b   :  { %1518 = vmatpush3.msra.mxu1 %v1940_v17  ;;  %1525 = vmatprep.mubr.msk.f32.mxu1 %vm1829_vm3, %v1828_v16 }
 0x10c   :  { %1519 = vmatprep.subr.mxu1 %v1828_v16 }
 0x10d   :  { %1520 = vmatpush3.msra.mxu1 %v1944_v19 }
 0x10e   :  { %1521 = vmatprep.subr.mxu1 %v1828_v16 }
 0x10f   :  { %1522 = vmatpush3.msra.mxu1 %v1948_v21 }
 0x110   :  { %1523 = vmatprep.subr.mxu1 %v1828_v16 }
 0x111   :  { %1524 = vmatpush3.msra.mxu1 %v1952_v22 }
 0x112   :  { %1526 = vmatmul.mubr.msk.f32.vlgmr.msra.gmra.mxu1 %vm217_vm2, %v397_v23  ;;  %1539 = vmatprep.subr.mxu1 %v1828_v16 }
 0x113   :  { %1540 = vmatpush3.msra.mxu1 %v1940_v17  ;;  %1547 = vmatprep.mubr.msk.f32.mxu1 %vm1829_vm3, %v1828_v16 }
 0x114   :  { %1541 = vmatprep.subr.mxu1 %v1828_v16 }
 0x115   :  { %1542 = vmatpush3.msra.mxu1 %v1944_v19 }
 0x116   :  { %1543 = vmatprep.subr.mxu1 %v1828_v16 }
 0x117   :  { %1544 = vmatpush3.msra.mxu1 %v1948_v21 }
 0x118   :  { %1545 = vmatprep.subr.mxu1 %v1828_v16 }
 0x119   :  { %1546 = vmatpush3.msra.mxu1 %v1952_v22 }
 0x11a   :  { %1561 = vmatprep.subr.mxu1 %v1828_v16 }
 0x1ca   :  { %v1505_v24 = vpop.f32.mrf.mxu1 }
 0x1cb   :  { %v296_v28 = vadd.f32 %v1505_v24, %v1407_v25 }
 0x1cc   :  { %v290_v26 = vpop.f32.mrf.mxu1 }
 0x1cd   :  { %v291_v27 = vadd.f32 %v1407_v25, %v290_v26 }
 0x1cf   :  { %1514 = vmatprep.mubr.msk.f32.mxu0 %vm217_vm2, %v291_v27 }
 0x1d0   :  { %1515 = vmatmul.mubr.msk.f32.vlgmr.msra.gmra.mxu0 %vm217_vm2, %v296_v28 }
 0x1d1   :  { %1529 = vmatpush3.msra.mxu0 %v1940_v17  ;;  %1536 = vmatprep.mubr.msk.f32.mxu0 %vm1829_vm3, %v1828_v16 }
 0x1d2   :  { %1530 = vmatprep.subr.mxu0 %v1828_v16  ;;  %v467_v29 = vpop.f32.mrf.mxu1 }
 0x1d3   :  { %1531 = vmatpush3.msra.mxu0 %v1944_v19 }
 0x1d4   :  { %1532 = vmatprep.subr.mxu0 %v1828_v16  ;;  %v1527_v30 = vpop.f32.mrf.mxu1 }
 0x1d5   :  { %1533 = vmatpush3.msra.mxu0 %v1948_v21 }
 0x1d6   :  { %1534 = vmatprep.subr.mxu0 %v1828_v16 }
 0x1d7   :  { %1535 = vmatpush3.msra.mxu0 %v1952_v22 }
 0x1d8   :  { %1550 = vmatprep.subr.mxu0 %v1828_v16 }
 0x290   :  { %v1516_v32 = vpop.f32.mrf.mxu0 }
 0x291   :  { %v1991_v33 = vadd.f32 %v1516_v32, %v1410_v31 }
 0x292   :  { %v382_v34 = vpop.f32.mrf.mxu0 }
 0x293   :  { %v1993_v35 = vadd.f32 %v1410_v31, %v382_v34 }
 0x295   :  { %v471_v36 = vadd.f32 %v467_v29, %v1993_v35 }
 0x297   :  { %1625 = vtanh.f32 %v471_v36  ;;  %v1414_v38 = vmul.f32 -1.442695, %v471_v36 }
 0x299   :  { %1627 = vpow2.f32 %v1414_v38 }
 0x2a4   :  { %v1626_v37 = vpop.eup %1625 }
 0x2a5   :  { %481 = vrot.lane.b32.xlu0 %v1626_v37, %s1830_s25 }
 0x2a6   :  { %v1628_v39 = vpop.eup %1627 }
 0x2a7   :  { %v475_v40 = vadd.f32 1.0, %v1628_v39 }
 0x2a9   :  { %1629 = vrcp.f32 %v475_v40 }
 0x2b6   :  { %v1630_v41 = vpop.eup %1629 }
 0x2b7   :  { %v478_v44 = vmul.f32 0.0, %v1630_v41 }
 0x317   :  { %v482_v42 = vpop.permute.xlu0 %481 }
 0x318   :  { %v484_v43 = vmul.f32 %v1630_v41, %v482_v42 }
 0x31a   :  { %486 = vrot.lane.b32.xlu0 %v484_v43, %s1831_s7 }
 0x38c   :  { %v487_v45 = vpop.permute.xlu0 %486 }
 0x38d   :  { %v489_v46 = vadd.f32 %v487_v45, %v478_v44 }
 0x38f   :  { %1631 = vtanh.f32 %v489_v46  ;;  %v606_v62 = vrot.slane %v489_v46, 6 }
 0x39c   :  { %v1632_v47 = vpop.eup %1631 }
 0x39d   :  { %492 = vrot.lane.b32.xlu1 %v1632_v47, %s1830_s25 }
 0x40f   :  { %v493_v48 = vpop.permute.xlu1 %492 }
 0x410   :  { %v1999_v49 = vmul.f32 %v1630_v41, %v493_v48 }
 0x412   :  { %521 = vrot.lane.b32.xlu1 %v1999_v49, %s1831_s7 }
 0x484   :  { %v522_v50 = vpop.permute.xlu1 %521 }
 0x485   :  { %1537 = vmatmul.mubr.msk.f32.vlgmr.msra.gmra.mxu0 %vm217_vm2, %v522_v50 }
 0x486   :  { %1551 = vmatpush3.msra.mxu0 %v1940_v17  ;;  %1558 = vmatprep.mubr.msk.f32.mxu0 %vm1829_vm3, %v1828_v16 }
 0x487   :  { %1552 = vmatprep.subr.mxu0 %v1828_v16 }
 0x488   :  { %1553 = vmatpush3.msra.mxu0 %v1944_v19 }
 0x489   :  { %1554 = vmatprep.subr.mxu0 %v1828_v16 }
 0x48a   :  { %1555 = vmatpush3.msra.mxu0 %v1948_v21 }
 0x48b   :  { %1556 = vmatprep.subr.mxu0 %v1828_v16 }
 0x48c   :  { %1557 = vmatpush3.msra.mxu0 %v1952_v22 }
 0x48d   :  { %1572 = vmatprep.subr.mxu0 %v1828_v16 }
 0x545   :  { %v591_v51 = vpop.f32.mrf.mxu0 }
 0x546   :  { %v596_v52 = vrot.slane %v591_v51, 6 }
 0x547   :  { %v1538_v53 = vpop.f32.mrf.mxu0 }
 0x548   :  { %v598_v54 = vadd.f32 %v596_v52, %v1993_v35 }
 0x54a   :  { %1633 = vtanh.f32 %v598_v54  ;;  %v1418_v56 = vmul.f32 -1.442695, %v598_v54 }
 0x54c   :  { %1635 = vpow2.f32 %v1418_v56 }
 0x557   :  { %v1634_v55 = vpop.eup %1633 }
 0x558   :  { %611 = vrot.lane.b32.xlu0 %v1634_v55, %s1830_s25 }
 0x559   :  { %v1636_v57 = vpop.eup %1635 }
 0x55a   :  { %v602_v58 = vadd.f32 1.0, %v1636_v57 }
 0x55c   :  { %1637 = vrcp.f32 %v602_v58 }
 0x569   :  { %v1638_v59 = vpop.eup %1637 }
 0x56a   :  { %v608_v63 = vmul.f32 %v1638_v59, %v606_v62 }
 0x5ca   :  { %v612_v60 = vpop.permute.xlu0 %611 }
 0x5cb   :  { %v614_v61 = vmul.f32 %v1638_v59, %v612_v60 }
 0x5cd   :  { %616 = vrot.lane.b32.xlu1 %v614_v61, %s1831_s7 }
 0x63f   :  { %v617_v0 = vpop.permute.xlu1 %616 }
 0x640   :  { %v619_v1 = vadd.f32 %v617_v0, %v608_v63 }
 0x642   :  { %1639 = vtanh.f32 %v619_v1  ;;  %v723_v23 = vrot.slane %v619_v1, 6 }
 0x64f   :  { %v1640_v2 = vpop.eup %1639 }
 0x650   :  { %622 = vrot.lane.b32.xlu0 %v1640_v2, %s1830_s25 }
 0x6c2   :  { %v623_v3 = vpop.permute.xlu0 %622 }
 0x6c3   :  { %v2018_v4 = vmul.f32 %v1638_v59, %v623_v3 }
 0x6c5   :  { %v637_v5 = vrot.slane %v2018_v4, 2 }
 0x6c7   :  { %638 = vrot.lane.b32.xlu1 %v637_v5, %s1831_s7 }
 0x739   :  { %v639_v6 = vpop.permute.xlu1 %638 }
 0x73a   :  { %1548 = vmatmul.mubr.msk.f32.vlgmr.msra.gmra.mxu1 %vm217_vm2, %v639_v6 }
 0x73b   :  { %1562 = vmatpush3.msra.mxu1 %v1940_v17  ;;  %1569 = vmatprep.mubr.msk.f32.mxu1 %vm1829_vm3, %v1828_v16 }
 0x73c   :  { %1563 = vmatprep.subr.mxu1 %v1828_v16 }
 0x73d   :  { %1564 = vmatpush3.msra.mxu1 %v1944_v19 }
 0x73e   :  { %1565 = vmatprep.subr.mxu1 %v1828_v16 }
 0x73f   :  { %1566 = vmatpush3.msra.mxu1 %v1948_v21 }
 0x740   :  { %1567 = vmatprep.subr.mxu1 %v1828_v16 }
 0x741   :  { %1568 = vmatpush3.msra.mxu1 %v1952_v22 }
 0x742   :  { %1583 = vmatprep.subr.mxu1 %v1828_v16 }
 0x7fa   :  { %v708_v7 = vpop.f32.mrf.mxu1 }
 0x7fb   :  { %v713_v8 = vrot.slane %v708_v7, 4 }
 0x7fc   :  { %v1549_v9 = vpop.f32.mrf.mxu1 }
 0x7fd   :  { %v715_v10 = vadd.f32 %v713_v8, %v1993_v35 }
 0x7ff   :  { %1641 = vtanh.f32 %v715_v10  ;;  %v1420_v12 = vmul.f32 -1.442695, %v715_v10 }
 0x801   :  { %1643 = vpow2.f32 %v1420_v12 }
 0x80c   :  { %v1642_v11 = vpop.eup %1641 }
 0x80d   :  { %728 = vrot.lane.b32.xlu0 %v1642_v11, %s1830_s25 }
 0x80e   :  { %v1644_v13 = vpop.eup %1643 }
 0x80f   :  { %v719_v14 = vadd.f32 1.0, %v1644_v13 }
 0x811   :  { %1645 = vrcp.f32 %v719_v14 }
 0x81e   :  { %v1646_v15 = vpop.eup %1645 }
 0x81f   :  { %v725_v24 = vmul.f32 %v1646_v15, %v723_v23 }
 0x87f   :  { %v729_v18 = vpop.permute.xlu0 %728 }
 0x880   :  { %v731_v20 = vmul.f32 %v1646_v15, %v729_v18 }
 0x882   :  { %733 = vrot.lane.b32.xlu1 %v731_v20, %s1831_s7 }
 0x8f4   :  { %v734_v25 = vpop.permute.xlu1 %733 }
 0x8f5   :  { %v736_v26 = vadd.f32 %v734_v25, %v725_v24 }
 0x8f7   :  { %1647 = vtanh.f32 %v736_v26  ;;  %v840_v45 = vrot.slane %v736_v26, 6 }
 0x904   :  { %v1648_v27 = vpop.eup %1647 }
 0x905   :  { %739 = vrot.lane.b32.xlu0 %v1648_v27, %s1830_s25 }
 0x977   :  { %v740_v28 = vpop.permute.xlu0 %739 }
 0x978   :  { %v2037_v29 = vmul.f32 %v1646_v15, %v740_v28 }
 0x97a   :  { %v754_v30 = vrot.slane %v2037_v29, 4 }
 0x97c   :  { %755 = vrot.lane.b32.xlu1 %v754_v30, %s1831_s7 }
 0x9ee   :  { %v756_v31 = vpop.permute.xlu1 %755 }
 0x9ef   :  { %1559 = vmatmul.mubr.msk.f32.vlgmr.msra.gmra.mxu0 %vm217_vm2, %v756_v31 }
 0x9f0   :  { %1573 = vmatpush3.msra.mxu0 %v1940_v17  ;;  %1580 = vmatprep.mubr.msk.f32.mxu0 %vm1829_vm3, %v1828_v16 }
 0x9f1   :  { %1574 = vmatprep.subr.mxu0 %v1828_v16 }
 0x9f2   :  { %1575 = vmatpush3.msra.mxu0 %v1944_v19 }
 0x9f3   :  { %1576 = vmatprep.subr.mxu0 %v1828_v16 }
 0x9f4   :  { %1577 = vmatpush3.msra.mxu0 %v1948_v21 }
 0x9f5   :  { %1578 = vmatprep.subr.mxu0 %v1828_v16 }
 0x9f6   :  { %1579 = vmatpush3.msra.mxu0 %v1952_v22 }
 0x9f7   :  { %1594 = vmatprep.subr.mxu0 %v1828_v16 }
 0xaaf   :  { %v825_v32 = vpop.f32.mrf.mxu0 }
 0xab0   :  { %v830_v34 = vrot.slane %v825_v32, 2 }
 0xab1   :  { %v1560_v36 = vpop.f32.mrf.mxu0 }
 0xab2   :  { %v832_v37 = vadd.f32 %v830_v34, %v1993_v35 }
 0xab4   :  { %1649 = vtanh.f32 %v832_v37  ;;  %v1422_v39 = vmul.f32 -1.442695, %v832_v37 }
 0xab6   :  { %1651 = vpow2.f32 %v1422_v39 }
 0xac1   :  { %v1650_v38 = vpop.eup %1649 }
 0xac2   :  { %845 = vrot.lane.b32.xlu0 %v1650_v38, %s1830_s25 }
 0xac3   :  { %v1652_v40 = vpop.eup %1651 }
 0xac4   :  { %v836_v41 = vadd.f32 1.0, %v1652_v40 }
 0xac6   :  { %1653 = vrcp.f32 %v836_v41 }
 0xad3   :  { %v1654_v42 = vpop.eup %1653 }
 0xad4   :  { %v842_v46 = vmul.f32 %v1654_v42, %v840_v45 }
 0xb34   :  { %v846_v43 = vpop.permute.xlu0 %845 }
 0xb35   :  { %v848_v44 = vmul.f32 %v1654_v42, %v846_v43 }
 0xb37   :  { %850 = vrot.lane.b32.xlu1 %v848_v44, %s1831_s7 }
 0xba9   :  { %v851_v47 = vpop.permute.xlu1 %850 }
 0xbaa   :  { %v853_v48 = vadd.f32 %v851_v47, %v842_v46 }
 0xbac   :  { %1655 = vtanh.f32 %v853_v48  ;;  %v954_v0 = vrot.slane %v853_v48, 6 }
 0xbb9   :  { %v1656_v35 = vpop.eup %1655 }
 0xbba   :  { %856 = vrot.lane.b32.xlu0 %v1656_v35, %s1830_s25 }
 0xc2c   :  { %v857_v50 = vpop.permute.xlu0 %856 }
 0xc2d   :  { %v2056_v51 = vmul.f32 %v1654_v42, %v857_v50 }
 0xc2f   :  { %v871_v52 = vrot.slane %v2056_v51, 6 }
 0xc31   :  { %872 = vrot.lane.b32.xlu1 %v871_v52, %s1831_s7 }
 0xca3   :  { %v873_v53 = vpop.permute.xlu1 %872 }
 0xca4   :  { %1570 = vmatmul.mubr.msk.f32.vlgmr.msra.gmra.mxu1 %vm217_vm2, %v873_v53 }
 0xca5   :  { %1584 = vmatpush3.msra.mxu1 %v1940_v17  ;;  %1591 = vmatprep.mubr.msk.f32.mxu1 %vm1829_vm3, %v1828_v16 }
 0xca6   :  { %1585 = vmatprep.subr.mxu1 %v1828_v16 }
 0xca7   :  { %1586 = vmatpush3.msra.mxu1 %v1944_v19 }
 0xca8   :  { %1587 = vmatprep.subr.mxu1 %v1828_v16 }
 0xca9   :  { %1588 = vmatpush3.msra.mxu1 %v1948_v21 }
 0xcaa   :  { %1589 = vmatprep.subr.mxu1 %v1828_v16 }
 0xcab   :  { %1590 = vmatpush3.msra.mxu1 %v1952_v22 }
 0xd64   :  { %v942_v54 = vpop.f32.mrf.mxu1 }
 0xd65   :  { %v946_v55 = vadd.f32 %v942_v54, %v1991_v33 }
 0xd66   :  { %v1571_v56 = vpop.f32.mrf.mxu1 }
 0xd67   :  { %1657 = vtanh.f32 %v946_v55  ;;  %v1424_v58 = vmul.f32 -1.442695, %v946_v55 }
 0xd69   :  { %1659 = vpow2.f32 %v1424_v58  ;;  %v1415_v58 = vld [vmem:[%s2137_s8] ss:$0 sm:$0xff]  ;;  %s1833_s8 = smov 1  }
 0xd74   :  { %v1658_v57 = vpop.eup %1657 }
 0xd75   :  { %959 = vrot.lane.b32.xlu0 %v1658_v57, %s1830_s25 }
 0xd76   :  { %v1660_v59 = vpop.eup %1659 }
 0xd77   :  { %v950_v60 = vadd.f32 1.0, %v1660_v59 }
 0xd79   :  { %1661 = vrcp.f32 %v950_v60 }
 0xd86   :  { %v1662_v61 = vpop.eup %1661 }
 0xd87   :  { %v956_v1 = vmul.f32 %v1662_v61, %v954_v0 }
 0xde7   :  { %v960_v62 = vpop.permute.xlu0 %959 }
 0xde8   :  { %v962_v63 = vmul.f32 %v1662_v61, %v960_v62 }
 0xdea   :  { %964 = vrot.lane.b32.xlu1 %v962_v63, %s1831_s7 }
 0xe5c   :  { %v965_v2 = vpop.permute.xlu1 %964 }
 0xe5d   :  { %v967_v3 = vadd.f32 %v965_v2, %v956_v1 }
 0xe5f   :  { %1663 = vtanh.f32 %v967_v3 }
 0xe6c   :  { %v1664_v5 = vpop.eup %1663 }
 0xe6d   :  { %970 = vrot.lane.b32.xlu0 %v1664_v5, %s1830_s25 }
 0xedf   :  { %v971_v6 = vpop.permute.xlu0 %970 }
 0xee0   :  { %v2074_v7 = vmul.f32 %v1662_v61, %v971_v6 }
 0xee2   :  { %984 = vrot.lane.b32.xlu1 %v2074_v7, %s1831_s7 }
 0xf54   :  { %v985_v8 = vpop.permute.xlu1 %984 }
 0xf55   :  { %1581 = vmatmul.mubr.msk.f32.vlgmr.msra.gmra.mxu0 %vm217_vm2, %v985_v8 }
 0xf56   :  { %1595 = vmatpush3.msra.mxu0 %v1940_v17  ;;  %1602 = vmatprep.mubr.msk.f32.mxu0 %vm1829_vm3, %v1828_v16 }
 0xf57   :  { %1596 = vmatprep.subr.mxu0 %v1828_v16 }
 0xf58   :  { %1597 = vmatpush3.msra.mxu0 %v1944_v19 }
 0xf59   :  { %1598 = vmatprep.subr.mxu0 %v1828_v16 }
 0xf5a   :  { %1599 = vmatpush3.msra.mxu0 %v1948_v21 }
 0xf5b   :  { %1600 = vmatprep.subr.mxu0 %v1828_v16  ;;  %v1069_v16 = vrot.slane %v967_v3, 6 }
 0xf5c   :  { %1601 = vmatpush3.msra.mxu0 %v1952_v22 }
0x1015   :  { %v1054_v9 = vpop.f32.mrf.mxu0 }
0x1016   :  { %v1059_v10 = vrot.slane %v1054_v9, 6 }
0x1017   :  { %v1582_v11 = vpop.f32.mrf.mxu0 }
0x1018   :  { %v1061_v17 = vadd.f32 %v1059_v10, %v1991_v33 }
0x101a   :  { %1665 = vtanh.f32 %v1061_v17  ;;  %v1426_v13 = vmul.f32 -1.442695, %v1061_v17 }
0x101c   :  { %1667 = vpow2.f32 %v1426_v13 }
0x1027   :  { %v1666_v12 = vpop.eup %1665 }
0x1028   :  { %1074 = vrot.lane.b32.xlu0 %v1666_v12, %s1830_s25 }
0x1029   :  { %v1668_v19 = vpop.eup %1667 }
0x102a   :  { %v1065_v14 = vadd.f32 1.0, %v1668_v19 }
0x102c   :  { %1669 = vrcp.f32 %v1065_v14 }
0x1039   :  { %v1670_v15 = vpop.eup %1669 }
0x103a   :  { %v1071_v22 = vmul.f32 %v1670_v15, %v1069_v16 }
0x109a   :  { %v1075_v21 = vpop.permute.xlu0 %1074 }
0x109b   :  { %v1077_v18 = vmul.f32 %v1670_v15, %v1075_v21 }
0x109d   :  { %1079 = vrot.lane.b32.xlu1 %v1077_v18, %s1831_s7 }
0x110f   :  { %v1080_v20 = vpop.permute.xlu1 %1079 }
0x1110   :  { %v1082_v23 = vadd.f32 %v1080_v20, %v1071_v22 }
0x1112   :  { %1671 = vtanh.f32 %v1082_v23  ;;  %v1185_v43 = vrot.slane %v1082_v23, 6 }
0x111f   :  { %v1672_v24 = vpop.eup %1671 }
0x1120   :  { %1085 = vrot.lane.b32.xlu0 %v1672_v24, %s1830_s25 }
0x1192   :  { %v1086_v25 = vpop.permute.xlu0 %1085 }
0x1193   :  { %v2092_v26 = vmul.f32 %v1670_v15, %v1086_v25 }
0x1195   :  { %v1099_v27 = vrot.slane %v2092_v26, 2 }
0x1197   :  { %1100 = vrot.lane.b32.xlu1 %v1099_v27, %s1831_s7  ;;  %v1416_v27 = vld [vmem:[#allocation2] ss:$0 sm:$0xff] }
0x1209   :  { %v1101_v28 = vpop.permute.xlu1 %1100 }
0x120a   :  { %1592 = vmatmul.mubr.msk.f32.vlgmr.msra.gmra.mxu1 %vm217_vm2, %v1101_v28 }
0x12ca   :  { %v1170_v30 = vpop.f32.mrf.mxu1 }
0x12cb   :  { %v1175_v31 = vrot.slane %v1170_v30, 4 }
0x12cc   :  { %v1593_v32 = vpop.f32.mrf.mxu1 }
0x12cd   :  { %v1177_v34 = vadd.f32 %v1175_v31, %v1991_v33 }
0x12cf   :  { %1673 = vtanh.f32 %v1177_v34  ;;  %v1428_v37 = vmul.f32 -1.442695, %v1177_v34 }
0x12d1   :  { %1675 = vpow2.f32 %v1428_v37 }
0x12dc   :  { %v1674_v36 = vpop.eup %1673 }
0x12dd   :  { %1190 = vrot.lane.b32.xlu0 %v1674_v36, %s1830_s25 }
0x12de   :  { %v1676_v38 = vpop.eup %1675 }
0x12df   :  { %v1181_v39 = vadd.f32 1.0, %v1676_v38 }
0x12e1   :  { %1677 = vrcp.f32 %v1181_v39 }
0x12ee   :  { %v1678_v40 = vpop.eup %1677 }
0x12ef   :  { %v1187_v44 = vmul.f32 %v1678_v40, %v1185_v43 }
0x134f   :  { %v1191_v41 = vpop.permute.xlu0 %1190 }
0x1350   :  { %v1193_v42 = vmul.f32 %v1678_v40, %v1191_v41 }
0x1352   :  { %1195 = vrot.lane.b32.xlu1 %v1193_v42, %s1831_s7 }
0x13c4   :  { %v1196_v45 = vpop.permute.xlu1 %1195 }
0x13c5   :  { %v1198_v46 = vadd.f32 %v1196_v45, %v1187_v44 }
0x13c7   :  { %1679 = vtanh.f32 %v1198_v46  ;;  %v1301_v5 = vrot.slane %v1198_v46, 6 }
0x13d4   :  { %v1680_v47 = vpop.eup %1679 }
0x13d5   :  { %1201 = vrot.lane.b32.xlu0 %v1680_v47, %s1830_s25 }
0x1447   :  { %v1202_v48 = vpop.permute.xlu0 %1201 }
0x1448   :  { %v1204_v35 = vmul.f32 %v1678_v40, %v1202_v48 }
0x144a   :  { %v1215_v50 = vrot.slane %v1204_v35, 4 }
0x144c   :  { %1216 = vrot.lane.b32.xlu1 %v1215_v50, %s1831_s7 }
0x14be   :  { %v1217_v52 = vpop.permute.xlu1 %1216 }
0x14bf   :  { %1603 = vmatmul.mubr.msk.f32.vlgmr.msra.gmra.mxu0 %vm217_vm2, %v1217_v52 }
0x157f   :  { %v1286_v53 = vpop.f32.mrf.mxu0 }
0x1580   :  { %v1291_v54 = vrot.slane %v1286_v53, 2 }
0x1581   :  { %v1604_v55 = vpop.f32.mrf.mxu0 }
0x1582   :  { %v1293_v56 = vadd.f32 %v1291_v54, %v1991_v33 }
0x1584   :  { %1681 = vtanh.f32 %v1293_v56  ;;  %v1430_v59 = vmul.f32 -1.442695, %v1293_v56 }
0x1586   :  { %1683 = vpow2.f32 %v1430_v59 }
0x1591   :  { %v1682_v57 = vpop.eup %1681 }
0x1592   :  { %1306 = vrot.lane.b32.xlu0 %v1682_v57, %s1830_s25 }
0x1593   :  { %v1684_v60 = vpop.eup %1683 }
0x1594   :  { %v1297_v61 = vadd.f32 1.0, %v1684_v60 }
0x1596   :  { %501 = vrot.lane.b32.xlu0 %v1415_v58, %s1832_s28  ;;  %1685 = vrcp.f32 %v1297_v61 }
0x15a3   :  { %v1686_v62 = vpop.eup %1685 }
0x15a4   :  { %v1303_v6 = vmul.f32 %v1686_v62, %v1301_v5 }
0x1604   :  { %v1307_v63 = vpop.permute.xlu0 %1306 }
0x1605   :  { %v1309_v0 = vmul.f32 %v1686_v62, %v1307_v63 }
0x1607   :  { %1311 = vrot.lane.b32.xlu1 %v1309_v0, %s1831_s7 }
0x1608   :  { %v502_v33 = vpop.permute.xlu0 %501 }
0x1609   :  { %v626_v1 = vmul.f32 %v2018_v4, %v502_v33  ;;  %v860_v2 = vmul.f32 %v2056_v51, %v502_v33  ;;  %v974_v3 = vmul.f32 %v2074_v7, %v502_v33  ;;  %v743_v4 = vmul.f32 %v2037_v29, %v502_v33 }
0x160a   :  { %v1089_v51 = vmul.f32 %v2092_v26, %v502_v33  ;;  %v1205_v11 = vmul.f32 %v1204_v35, %v502_v33  ;;  %v504_v7 = vmul.f32 %v502_v33, %v1999_v49 }
0x160b   :  { %628 = vrot.lane.b32.xlu0 %v626_v1, %s1831_s7 }
0x160f   :  { %862 = vrot.lane.b32.xlu0 %v860_v2, %s1831_s7 }
0x1613   :  { %976 = vrot.lane.b32.xlu0 %v974_v3, %s1831_s7 }
0x1679   :  { %v1312_v8 = vpop.permute.xlu1 %1311 }
0x167a   :  { %v1314_v9 = vadd.f32 %v1312_v8, %v1303_v6 }
0x167c   :  { %1687 = vtanh.f32 %v1314_v9 }
0x167d   :  { %v629_v17 = vpop.permute.xlu0 %628 }
0x167e   :  { %v632_v13 = vsel %vm631_vm4, %v629_v17, 0.0 }
0x1681   :  { %v863_v12 = vpop.permute.xlu0 %862 }
0x1682   :  { %v866_v25 = vsel %vm865_vm7, %v863_v12, 0.0 }
0x1685   :  { %v977_v19 = vpop.permute.xlu0 %976 }
0x1686   :  { %v979_v29 = vsel %vm509_vm5, %v977_v19, 0.0 }
0x1689   :  { %v1688_v10 = vpop.eup %1687 }
0x168a   :  { %1317 = vrot.lane.b32.xlu1 %v1688_v10, %s1830_s25 }
0x168e   :  { %745 = vrot.lane.b32.xlu1 %v743_v4, %s1831_s7 }
0x1692   :  { %1091 = vrot.lane.b32.xlu1 %v1089_v51, %s1831_s7 }
0x1696   :  { %1207 = vrot.lane.b32.xlu1 %v1205_v11, %s1831_s7 }
0x169a   :  { %506 = vrot.lane.b32.xlu1 %v504_v7, %s1831_s7 }
0x16be   :  { %633 = vadd.xlane.f32.xlu1 %v632_v13 }
0x16c2   :  { %980 = vadd.xlane.f32.xlu1 %v979_v29 }
0x16fc   :  { %v1318_v14 = vpop.permute.xlu1 %1317 }
0x16fd   :  { %v1320_v15 = vmul.f32 %v1686_v62, %v1318_v14 }
0x16ff   :  { %v1321_v21 = vmul.f32 %v1320_v15, %v502_v33 }
0x1700   :  { %v746_v18 = vpop.permute.xlu1 %745 }
0x1701   :  { %1323 = vrot.lane.b32.xlu0 %v1321_v21, %s1831_s7  ;;  %v749_v24 = vsel %vm748_vm6, %v746_v18, 0.0 }
0x1704   :  { %v1092_v16 = vpop.permute.xlu1 %1091 }
0x1705   :  { %v1094_v26 = vsel %vm631_vm4, %v1092_v16, 0.0 }
0x1708   :  { %v1208_v49 = vpop.permute.xlu1 %1207 }
0x1709   :  { %v1210_v22 = vsel %vm748_vm6, %v1208_v49, 0.0 }
0x170a   :  { %1211 = vadd.xlane.f32.xlu1 %v1210_v22 }
0x170c   :  { %v507_v20 = vpop.permute.xlu1 %506 }
0x170d   :  { %v510_v23 = vsel %vm509_vm5, %v507_v20, 0.0 }
0x1720   :  { %511 = vadd.xlane.f32.xlu0 %v510_v23 }
0x1724   :  { %750 = vadd.xlane.f32.xlu0 %v749_v24 }
0x1728   :  { %867 = vadd.xlane.f32.xlu0 %v866_v25 }
0x172c   :  { %1095 = vadd.xlane.f32.xlu0 %v1094_v26 }
0x1747   :  { %v634_v28 = vpop.xlane.xlu1 %633 }
0x1748   :  { %v635_v30 = vadd.f32 %v1416_v27, %v634_v28 }
0x174a   :  { %v1331_v31 = vrot.slane %v635_v30, 2 }
0x174b   :  { %v981_v40 = vpop.xlane.xlu1 %980 }
0x174c   :  { %1332 = vrot.lane.b32.xlu1 %v1331_v31, %s1833_s8  ;;  %v982_v47 = vadd.f32 %v1416_v27, %v981_v40 }
0x1773   :  { %v1324_v32 = vpop.permute.xlu0 %1323 }
0x1774   :  { %v1326_v34 = vsel %vm865_vm7, %v1324_v32, 0.0 }
0x1775   :  { %1327 = vadd.xlane.f32.xlu0 %v1326_v34 }
0x1793   :  { %v1212_v44 = vpop.xlane.xlu1 %1211 }
0x1794   :  { %v1213_v48 = vadd.f32 %v1416_v27, %v1212_v44 }
0x1796   :  { %v1355_v50 = vrot.slane %v1213_v48, 4 }
0x17a9   :  { %v512_v36 = vpop.xlane.xlu0 %511 }
0x17aa   :  { %v519_v57 = vadd.f32 %v1416_v27, %v512_v36 }
0x17ad   :  { %v751_v37 = vpop.xlane.xlu0 %750 }
0x17ae   :  { %v752_v38 = vadd.f32 %v1416_v27, %v751_v37 }
0x17b0   :  { %v1336_v39 = vrot.slane %v752_v38, 4 }
0x17b1   :  { %v868_v41 = vpop.xlane.xlu0 %867 }
0x17b2   :  { %v869_v42 = vadd.f32 %v1416_v27, %v868_v41  ;;  %1337 = vrot.lane.b32.xlu0 %v1336_v39, %s1834_s29 }
0x17b4   :  { %v1341_v43 = vrot.slane %v869_v42, 6 }
0x17b5   :  { %v1096_v45 = vpop.xlane.xlu0 %1095 }
0x17b6   :  { %v1097_v46 = vadd.f32 %v1416_v27, %v1096_v45  ;;  %1342 = vrot.lane.b32.xlu1 %v1341_v43, %s1835_s30 }
0x17b8   :  { %v1350_v35 = vrot.slane %v1097_v46, 2 }
0x17ba   :  { %1351 = vrot.lane.b32.xlu0 %v1350_v35, %s1836_s12  ;;  %1346 = vrot.lane.b32.xlu1 %v982_v47, %s1837_s13 }
0x17be   :  { %1356 = vrot.lane.b32.xlu1 %v1355_v50, %s1838_s14  ;;  %v1333_v55 = vpop.permute.xlu1 %1332 }
0x17bf   :  { %v1365_v60 = vsel %vm1364_vm8, %v519_v57, %v1333_v55 }
0x17fe   :  { %v1328_v52 = vpop.xlane.xlu0 %1327 }
0x17ff   :  { %v1329_v53 = vadd.f32 %v1416_v27, %v1328_v52 }
0x1801   :  { %v1360_v54 = vrot.slane %v1329_v53, 6 }
0x1803   :  { %1361 = vrot.lane.b32.xlu0 %v1360_v54, %s1839_s1 }
0x1824   :  { %v1338_v58 = vpop.permute.xlu0 %1337 }
0x1825   :  { %v1367_v61 = vsel %vm1366_vm9, %v1365_v60, %v1338_v58 }
0x1828   :  { %v1343_v56 = vpop.permute.xlu1 %1342 }
0x1829   :  { %v1369_v62 = vsel %vm1368_vm10, %v1367_v61, %v1343_v56 }
0x182c   :  { %v1347_v59 = vpop.permute.xlu1 %1346  ;;  %v1352_v63 = vpop.permute.xlu0 %1351 }
0x182d   :  { %v1371_v0 = vsel %vm1370_vm11, %v1369_v62, %v1347_v59 }
0x182e   :  { %v1373_v1 = vsel %vm1372_vm12, %v1371_v0, %v1352_v63 }
0x1830   :  { %v1357_v33 = vpop.permute.xlu1 %1356 }
0x1831   :  { %v1375_v2 = vsel %vm1374_vm13, %v1373_v1, %v1357_v33 }
0x1875   :  { %v1362_v3 = vpop.permute.xlu0 %1361 }
0x1876   :  { %v1377_v5 = vsel %vm1376_vm14, %v1375_v2, %v1362_v3 }
0x1877   :  { %v1431_v6 = vmul.f32 -1.442695, %v1377_v5 }
0x1879   :  { %1689 = vpow2.f32 %v1431_v6 }
0x1886   :  { %v1690_v8 = vpop.eup %1689 }
0x1887   :  { %v1381_v9 = vadd.f32 1.0, %v1690_v8 }
0x1889   :  { %1691 = vrcp.f32 %v1381_v9 }
0x1896   :  { %v1692_v10 = vpop.eup %1691 }
0x1897   :  { %1385 = vst.msk [vmem:[#allocation12] sm:$0x3] %vm1384_vm15, %v1692_v10 }
0x1898   :  { %1804 = shalt.err (!%p1801_p1)
}
0x1899   :  { %1395 = dma.vmem_to_hbm [thread:$0]  %s1393_s16, 32, %s2140_s11, [#allocation5]  }
0x189a   :  { %1819 = dma.done.wait [#allocation5], 32  }
0x189b   :  { %1820 = vsyncadd [#allocation5], 4294967264 }
0x189c   :  { %1399 = vsyncpa [#allocation4], 1 }
0x189d   :  { %1400 = vsyncpa [#allocation7], 1 }
0x189e   :  { %1401 = vsyncpa [#allocation10], 1 }
0x189f   :  { %1402 = vsyncpa [#allocation5], 1 }

</bundles_post_ra>
